<compile_context>
chip_gen: v7x
topology: tpu7x:2x2x1
jax: 0.10.0
libtpu: 0.0.40
codegen_flags: <defaults>
</compile_context>

<pallas_src>
import functools

import jax
import jax.numpy as jnp
import numpy as np
from jax.experimental import pallas as pl
from jax.experimental.pallas import tpu as pltpu

FACTOR = 4
WIN = 11              # SSIM kernel_size=11, gaussian_kernel=False (uniform window)
K1, K2 = 0.01, 0.03   # torchmetrics SSIM constants


def _round_up(x, m):
    return (x + m - 1) // m * m


def _bilinear_taps(factor):
    w = np.array([1.0 - abs((i + 0.5 - factor) / factor) for i in range(2 * factor)],
                 np.float64)
    return w / w.sum()


@functools.lru_cache(maxsize=None)
def _build_matrices(H, W, h, w):
    """Per-image static matrices (no N-fold kron block-diagonals)."""
    taps = _bilinear_taps(FACTOR)
    K = len(taps)
    padl = (K - 1) // 2

    def circulant(n):
        # circular conv: out[i] = sum_p taps[p] * x[(i + p - padl) % n]
        M = np.zeros((n, n), np.float64)
        for i in range(n):
            for p in range(K):
                M[i, (i + p - padl) % n] += taps[p]
        return M

    def adjoint_up(n_hi, n_lo):
        # polyphase A_adjoint of Downsampling: zero-insertion + circular conv folded into a
        # (n_hi, n_lo) matrix; only taps hitting non-zero samples survive.
        M = np.zeros((n_hi, n_lo), np.float64)
        for i in range(n_hi):
            for p in range(K):
                r = (i + p - padl) % n_hi
                if r % FACTOR == 0:
                    M[i, r // FACTOR] += taps[p]
        return M

    Ho, Wo = H - WIN + 1, W - WIN + 1
    Ho_p, Wo_p = _round_up(Ho, 8), _round_up(Wo, 128)

    def box_band(n_out, n_out_pad, n_in):
        # 1/WIN folded in at build time; rows beyond n_out are zero so box maps are tile-dense.
        M = np.zeros((n_out_pad, n_in), np.float64)
        for i in range(n_out):
            M[i, i:i + WIN] = 1.0 / WIN
        return M

    uv = adjoint_up(H, h)                    # (H, h)     vertical adjoint-upsample (left mm)
    uh = adjoint_up(W, w).T                  # (w, W)     horizontal adjoint-upsample (right mm)
    cv = circulant(H)                        # (H, H)     vertical circular blur (left mm)
    ch = circulant(W).T                      # (W, W)     horizontal circular blur (right mm)
    bv = box_band(Ho, Ho_p, H)               # (Ho_p, H)  vertical box window (left mm)
    bh = box_band(Wo, Wo_p, W).T             # (W, Wo_p)  horizontal box window (right mm)
    return tuple(m.astype(np.float32) for m in (uv, uh, cv, ch, bv, bh))


# ---------- in-kernel helpers ----------

def _rmin(a):
    return jnp.min(jnp.min(a, axis=1, keepdims=True), axis=0, keepdims=True)


def _rmax(a):
    return jnp.max(jnp.max(a, axis=1, keepdims=True), axis=0, keepdims=True)


def _rsum(a):
    return jnp.sum(jnp.sum(a, axis=1, keepdims=True), axis=0, keepdims=True)


def _mm(a, b):
    return jnp.dot(a, b, preferred_element_type=jnp.float32)


def _upsample(lrms, uv, uh):
    # A_adjoint of Downsampling(4,'bilinear'): reassociated uv @ (lrms @ uh) so the wide
    # horizontal pass runs on h rows; bf16 MXU, f32 accumulate.
    t = _mm(lrms, uh).astype(jnp.bfloat16)
    return _mm(uv, t)                                           # (H, W) f32


def _blur(hrms, cv, ch):
    # Blur(bilinear, circular): two circulant bf16 MXU matmuls, f32 accumulate.
    t = _mm(hrms, ch).astype(jnp.bfloat16)
    return _mm(cv, t)                                           # (H, W) f32


def _lanes(values):
    # Pack a few (1,1) scalars into one (1, 8) lane vector without scatters.
    lane = jax.lax.broadcasted_iota(jnp.int32, (1, 8), 1)
    out = jnp.zeros((1, 8), jnp.float32)
    for i, v in enumerate(values):
        out = out + jnp.where(lane == i, v, 0.0)
    return out


# ---------- pass 1: per-image min/max stats ----------

def _stats_kernel(lrms_ref, hrms_ref, uv_ref, uh_ref, cv_ref, ch_ref, stats_ref):
    lrms = lrms_ref[0]                                          # (h, w) bf16
    hrms = hrms_ref[0]                                          # (H, W) bf16
    lrms_up = _upsample(lrms, uv_ref[...], uh_ref[...])         # (H, W) f32
    x_p = _blur(hrms, cv_ref[...], ch_ref[...])                 # (H, W) f32
    lr32 = lrms.astype(jnp.float32)
    stats_ref[...] = _lanes([
        _rmin(lr32), _rmax(lr32),
        _rmin(lrms_up), _rmax(lrms_up),
        _rmin(x_p), _rmax(x_p),
    ]).reshape(1, 1, 8)


# ---------- pass 2: per-image MSE / SSIM partial sums ----------

def _make_loss_kernel(Ho, Wo, Ho_p, Wo_p):
    def kernel(params_ref, lrms_ref, hrms_ref, uv_ref, uh_ref, cv_ref, ch_ref,
               bv_ref, bh_ref, part_ref):
        p = params_ref[...]                                     # (1, 8) f32 scalar row
        bmin, t_scale, amin = p[:, 0:1], p[:, 1:2], p[:, 2:3]   # broadcastable (1,1)
        c1, c2 = p[:, 3:4], p[:, 4:5]

        lrms = lrms_ref[0]                                      # (h, w) bf16
        hrms = hrms_ref[0]                                      # (H, W) bf16

        # target: rescale_tensor(A_adjoint(lrms), lrms)
        lrms_up = _upsample(lrms, uv_ref[...], uh_ref[...])
        y_t = (lrms_up - bmin) * t_scale + amin                 # f32
        # pred: Blur(bilinear, circular)(hrms)
        x_p = _blur(hrms, cv_ref[...], ch_ref[...])             # f32

        # MSE partial sum
        d = x_p - y_t
        sse = _rsum(d * d)                                      # (1, 1)

        # SSIM ('valid' 11x11 uniform window) via padded banded matmuls, streamed per field.
        bv, bh = bv_ref[...], bh_ref[...]

        def box(a):                                             # f32 (H,W) -> f32 (Ho_p, Wo_p)
            t = _mm(bv, a.astype(jnp.bfloat16)).astype(jnp.bfloat16)
            return _mm(t, bh)

        mu_x = box(x_p)
        mu_y = box(y_t)
        mu_x2 = mu_x * mu_x
        mu_y2 = mu_y * mu_y
        mxy = mu_x * mu_y
        # TODO(synk): E[x^2]-mu^2 form matches torchmetrics but can cancel slightly in f32.
        num = (2.0 * mxy + c1) * (2.0 * (box(x_p * y_t) - mxy) + c2)
        den = (mu_x2 + mu_y2 + c1) * ((box(x_p * x_p) - mu_x2)
                                      + (box(y_t * y_t) - mu_y2) + c2)
        ratio = num / den                                       # exact divide (not approx recip)

        # Padded cells would evaluate to SSIM == 1: mask them out of the reduction.
        row = jax.lax.broadcasted_iota(jnp.int32, (Ho_p, Wo_p), 0)
        col = jax.lax.broadcasted_iota(jnp.int32, (Ho_p, Wo_p), 1)
        ssim = _rsum(jnp.where((row < Ho) & (col < Wo), ratio, 0.0))

        part_ref[...] = _lanes([sse, ssim]).reshape(1, 1, 8)

    return kernel


# ---------- wrapper ----------

def ssq_spectral_loss(y, x_net):
    B, Cp1, H, W = y.shape
    C = Cp1 - 1
    N = B * C
    h, w = H // FACTOR, W // FACTOR
    Ho, Wo = H - WIN + 1, W - WIN + 1
    Ho_p, Wo_p = _round_up(Ho, 8), _round_up(Wo, 128)

    # lrms_from_volume / hrms_from_volume (corner-embedding convention, see header TODO).
    lrms = y[:, :C, :h, :w].reshape(N, h, w).astype(jnp.bfloat16)
    hrms = x_net[:, :C].reshape(N, H, W).astype(jnp.bfloat16)

    uv, uh, cv, ch, bv, bh = (jnp.asarray(m, jnp.bfloat16)
                              for m in _build_matrices(H, W, h, w))

    # Constants keep a constant block index -> DMA'd once and resident across the grid.
    def const_spec(shp):
        return pl.BlockSpec(shp, lambda n, _s=len(shp): (0,) * _s)

    img_lr_spec = pl.BlockSpec((1, h, w), lambda n: (n, 0, 0))
    img_hr_spec = pl.BlockSpec((1, H, W), lambda n: (n, 0, 0))
    out_spec = pl.BlockSpec((1, 1, 8), lambda n: (n, 0, 0))
    cparams = pltpu.CompilerParams(dimension_semantics=("parallel",))

    # Pass 1: per-image min/max of lrms, lrms_up, blurred hrms.
    stats = pl.pallas_call(
        _stats_kernel,
        grid=(N,),
        in_specs=[img_lr_spec, img_hr_spec,
                  const_spec((H, h)), const_spec((w, W)),
                  const_spec((H, H)), const_spec((W, W))],
        out_specs=out_spec,
        out_shape=jax.ShapeDtypeStruct((N, 1, 8), jnp.float32),
        compiler_params=cparams,
    )(lrms, hrms, uv, uh, cv, ch)

    # Tiny XLA epilogue: global stats -> rescale + SSIM-constant scalars.
    s = stats.reshape(N, 8)
    amin, amax = jnp.min(s[:, 0]), jnp.max(s[:, 1])
    bmin, bmax = jnp.min(s[:, 2]), jnp.max(s[:, 3])
    pmin, pmax = jnp.min(s[:, 4]), jnp.max(s[:, 5])
    span = bmax - bmin
    span = jnp.where(span > 0.0, span, 1.0)     # guard: constant lrms_up -> target collapses to amin
    t_scale = (amax - amin) / span
    data_range = jnp.maximum(pmax - pmin, amax - amin)
    c1 = (K1 * data_range) ** 2
    c2 = (K2 * data_range) ** 2
    zero = jnp.float32(0.0)
    params = jnp.stack([bmin, t_scale, amin, c1, c2, zero, zero, zero]
                       ).reshape(1, 8).astype(jnp.float32)

    # Pass 2: per-image MSE / SSIM partial sums.
    parts = pl.pallas_call(
        _make_loss_kernel(Ho, Wo, Ho_p, Wo_p),
        grid=(N,),
        in_specs=[const_spec((1, 8)),
                  img_lr_spec, img_hr_spec,
                  const_spec((H, h)), const_spec((w, W)),
                  const_spec((H, H)), const_spec((W, W)),
                  const_spec((Ho_p, H)), const_spec((W, Wo_p))],
        out_specs=out_spec,
        out_shape=jax.ShapeDtypeStruct((N, 1, 8), jnp.float32),
        compiler_params=cparams,
    )(params, lrms, hrms, uv, uh, cv, ch, bv, bh)

    sse_total = jnp.sum(parts[:, 0, 0])
    ssim_total = jnp.sum(parts[:, 0, 1])
    mse = sse_total / (N * H * W)
    ssim_mean = ssim_total / (N * Ho * Wo)
    return mse + 1.0 - ssim_mean


if __name__ == "__main__":
    key = jax.random.PRNGKey(0)
    k1, k2 = jax.random.split(key)
    B, C, H, W = 2, 4, 32, 32                  # C MS bands + 1 PAN channel
    y = jax.random.uniform(k1, (B, C + 1, H, W), dtype=jnp.float32)
    x_net = jax.random.uniform(k2, (B, C + 1, H, W), dtype=jnp.float32)

    loss = jax.jit(ssq_spectral_loss)(y, x_net)
    jax.block_until_ready(loss)
    assert loss.shape == () and bool(jnp.isfinite(loss))
    print("KERNEL_OK")
</pallas_src>

<mosaic_0001>
module attributes {stable_mosaic.version = 11 : i64} {
  func.func @_stats_kernel(%arg0: i32, %arg1: memref<1x8x8xbf16, #tpu.memory_space<vmem>>, %arg2: memref<1x32x32xbf16, #tpu.memory_space<vmem>>, %arg3: memref<32x8xbf16, #tpu.memory_space<vmem>>, %arg4: memref<8x32xbf16, #tpu.memory_space<vmem>>, %arg5: memref<32x32xbf16, #tpu.memory_space<vmem>>, %arg6: memref<32x32xbf16, #tpu.memory_space<vmem>>, %arg7: memref<1x1x8xf32, #tpu.memory_space<vmem>>) attributes {dimension_semantics = [#tpu.dimension_semantics<parallel>], iteration_bounds = array<i64: 8>, scalar_prefetch = 0 : i64, scratch_operands = 0 : i64, tpu.core_type = #tpu.core_type<tc>, window_params = [{transform_indices = @transform_0, window_bounds = array<i64: 1, 8, 8>}, {transform_indices = @transform_1, window_bounds = array<i64: 1, 32, 32>}, {pipeline_mode = #tpu.pipeline_mode<synchronous>, transform_indices = @transform_2, window_bounds = array<i64: 32, 8>}, {pipeline_mode = #tpu.pipeline_mode<synchronous>, transform_indices = @transform_3, window_bounds = array<i64: 8, 32>}, {pipeline_mode = #tpu.pipeline_mode<synchronous>, transform_indices = @transform_4, window_bounds = array<i64: 32, 32>}, {pipeline_mode = #tpu.pipeline_mode<synchronous>, transform_indices = @transform_5, window_bounds = array<i64: 32, 32>}, {transform_indices = @transform_6, window_bounds = array<i64: 1, 1, 8>}]} {
    %c0 = arith.constant 0 : index
    %c0_0 = arith.constant 0 : index
    %c0_1 = arith.constant 0 : index
    %0 = vector.load %arg1[%c0, %c0_0, %c0_1] : memref<1x8x8xbf16, #tpu.memory_space<vmem>>, vector<1x8x8xbf16>
    %1 = vector.shape_cast %0 : vector<1x8x8xbf16> to vector<8x8xbf16>
    %c0_2 = arith.constant 0 : index
    %c0_3 = arith.constant 0 : index
    %c0_4 = arith.constant 0 : index
    %2 = vector.load %arg2[%c0_2, %c0_3, %c0_4] : memref<1x32x32xbf16, #tpu.memory_space<vmem>>, vector<1x32x32xbf16>
    %3 = vector.shape_cast %2 : vector<1x32x32xbf16> to vector<32x32xbf16>
    %c0_5 = arith.constant 0 : index
    %c0_6 = arith.constant 0 : index
    %4 = vector.load %arg3[%c0_5, %c0_6] : memref<32x8xbf16, #tpu.memory_space<vmem>>, vector<32x8xbf16>
    %c0_7 = arith.constant 0 : index
    %c0_8 = arith.constant 0 : index
    %5 = vector.load %arg4[%c0_7, %c0_8] : memref<8x32xbf16, #tpu.memory_space<vmem>>, vector<8x32xbf16>
    %cst = arith.constant dense<0.000000e+00> : vector<8x32xf32>
    %6 = tpu.matmul %1, %5, %cst {dimension_numbers = #tpu.dot_dimension_numbers<[1], [0], [0], [1], [0, 0, 1, 1], [], []>} : vector<8x8xbf16>, vector<8x32xbf16>, vector<8x32xf32> -> vector<8x32xf32>
    %7 = arith.truncf %6 : vector<8x32xf32> to vector<8x32xbf16>
    %cst_9 = arith.constant dense<0.000000e+00> : vector<32x32xf32>
    %8 = tpu.matmul %4, %7, %cst_9 {dimension_numbers = #tpu.dot_dimension_numbers<[1], [0], [0], [1], [0, 0, 1, 1], [], []>} : vector<32x8xbf16>, vector<8x32xbf16>, vector<32x32xf32> -> vector<32x32xf32>
    %c0_10 = arith.constant 0 : index
    %c0_11 = arith.constant 0 : index
    %9 = vector.load %arg5[%c0_10, %c0_11] : memref<32x32xbf16, #tpu.memory_space<vmem>>, vector<32x32xbf16>
    %c0_12 = arith.constant 0 : index
    %c0_13 = arith.constant 0 : index
    %10 = vector.load %arg6[%c0_12, %c0_13] : memref<32x32xbf16, #tpu.memory_space<vmem>>, vector<32x32xbf16>
    %cst_14 = arith.constant dense<0.000000e+00> : vector<32x32xf32>
    %11 = tpu.matmul %3, %10, %cst_14 {dimension_numbers = #tpu.dot_dimension_numbers<[1], [0], [0], [1], [0, 0, 1, 1], [], []>} : vector<32x32xbf16>, vector<32x32xbf16>, vector<32x32xf32> -> vector<32x32xf32>
    %12 = arith.truncf %11 : vector<32x32xf32> to vector<32x32xbf16>
    %cst_15 = arith.constant dense<0.000000e+00> : vector<32x32xf32>
    %13 = tpu.matmul %9, %12, %cst_15 {dimension_numbers = #tpu.dot_dimension_numbers<[1], [0], [0], [1], [0, 0, 1, 1], [], []>} : vector<32x32xbf16>, vector<32x32xbf16>, vector<32x32xf32> -> vector<32x32xf32>
    %14 = arith.extf %1 : vector<8x8xbf16> to vector<8x8xf32>
    %cst_16 = arith.constant dense<0x7F800000> : vector<8xf32>
    %15 = vector.multi_reduction <minimumf>, %14, %cst_16 [1] : vector<8x8xf32> to vector<8xf32>
    %16 = vector.shape_cast %15 : vector<8xf32> to vector<8x1xf32>
    %cst_17 = arith.constant dense<0x7F800000> : vector<1xf32>
    %17 = vector.multi_reduction <minimumf>, %16, %cst_17 [0] : vector<8x1xf32> to vector<1xf32>
    %18 = vector.shape_cast %17 : vector<1xf32> to vector<1x1xf32>
    %cst_18 = arith.constant dense<0xFF800000> : vector<8xf32>
    %19 = vector.multi_reduction <maximumf>, %14, %cst_18 [1] : vector<8x8xf32> to vector<8xf32>
    %20 = vector.shape_cast %19 : vector<8xf32> to vector<8x1xf32>
    %cst_19 = arith.constant dense<0xFF800000> : vector<1xf32>
    %21 = vector.multi_reduction <maximumf>, %20, %cst_19 [0] : vector<8x1xf32> to vector<1xf32>
    %22 = vector.shape_cast %21 : vector<1xf32> to vector<1x1xf32>
    %cst_20 = arith.constant dense<0x7F800000> : vector<32xf32>
    %23 = vector.multi_reduction <minimumf>, %8, %cst_20 [1] : vector<32x32xf32> to vector<32xf32>
    %24 = vector.shape_cast %23 : vector<32xf32> to vector<32x1xf32>
    %cst_21 = arith.constant dense<0x7F800000> : vector<1xf32>
    %25 = vector.multi_reduction <minimumf>, %24, %cst_21 [0] : vector<32x1xf32> to vector<1xf32>
    %26 = vector.shape_cast %25 : vector<1xf32> to vector<1x1xf32>
    %cst_22 = arith.constant dense<0xFF800000> : vector<32xf32>
    %27 = vector.multi_reduction <maximumf>, %8, %cst_22 [1] : vector<32x32xf32> to vector<32xf32>
    %28 = vector.shape_cast %27 : vector<32xf32> to vector<32x1xf32>
    %cst_23 = arith.constant dense<0xFF800000> : vector<1xf32>
    %29 = vector.multi_reduction <maximumf>, %28, %cst_23 [0] : vector<32x1xf32> to vector<1xf32>
    %30 = vector.shape_cast %29 : vector<1xf32> to vector<1x1xf32>
    %cst_24 = arith.constant dense<0x7F800000> : vector<32xf32>
    %31 = vector.multi_reduction <minimumf>, %13, %cst_24 [1] : vector<32x32xf32> to vector<32xf32>
    %32 = vector.shape_cast %31 : vector<32xf32> to vector<32x1xf32>
    %cst_25 = arith.constant dense<0x7F800000> : vector<1xf32>
    %33 = vector.multi_reduction <minimumf>, %32, %cst_25 [0] : vector<32x1xf32> to vector<1xf32>
    %34 = vector.shape_cast %33 : vector<1xf32> to vector<1x1xf32>
    %cst_26 = arith.constant dense<0xFF800000> : vector<32xf32>
    %35 = vector.multi_reduction <maximumf>, %13, %cst_26 [1] : vector<32x32xf32> to vector<32xf32>
    %36 = vector.shape_cast %35 : vector<32xf32> to vector<32x1xf32>
    %cst_27 = arith.constant dense<0xFF800000> : vector<1xf32>
    %37 = vector.multi_reduction <maximumf>, %36, %cst_27 [0] : vector<32x1xf32> to vector<1xf32>
    %38 = vector.shape_cast %37 : vector<1xf32> to vector<1x1xf32>
    %39 = tpu.iota {dimensions = array<i32: 1>} : vector<1x8xi32>
    %cst_28 = arith.constant 0.000000e+00 : f32
    %40 = vector.broadcast %cst_28 : f32 to vector<1x8xf32>
    %c0_i32 = arith.constant 0 : i32
    %41 = vector.broadcast %c0_i32 : i32 to vector<1x8xi32>
    %42 = arith.cmpi eq, %39, %41 : vector<1x8xi32>
    %cst_29 = arith.constant 0.000000e+00 : f32
    %43 = vector.shape_cast %18 : vector<1x1xf32> to vector<1x1xf32>
    %44 = vector.broadcast %43 : vector<1x1xf32> to vector<1x8xf32>
    %45 = vector.broadcast %cst_29 : f32 to vector<1x8xf32>
    %46 = arith.select %42, %44, %45 : vector<1x8xi1>, vector<1x8xf32>
    %47 = arith.addf %40, %46 : vector<1x8xf32>
    %c1_i32 = arith.constant 1 : i32
    %48 = vector.broadcast %c1_i32 : i32 to vector<1x8xi32>
    %49 = arith.cmpi eq, %39, %48 : vector<1x8xi32>
    %cst_30 = arith.constant 0.000000e+00 : f32
    %50 = vector.shape_cast %22 : vector<1x1xf32> to vector<1x1xf32>
    %51 = vector.broadcast %50 : vector<1x1xf32> to vector<1x8xf32>
    %52 = vector.broadcast %cst_30 : f32 to vector<1x8xf32>
    %53 = arith.select %49, %51, %52 : vector<1x8xi1>, vector<1x8xf32>
    %54 = arith.addf %47, %53 : vector<1x8xf32>
    %c2_i32 = arith.constant 2 : i32
    %55 = vector.broadcast %c2_i32 : i32 to vector<1x8xi32>
    %56 = arith.cmpi eq, %39, %55 : vector<1x8xi32>
    %cst_31 = arith.constant 0.000000e+00 : f32
    %57 = vector.shape_cast %26 : vector<1x1xf32> to vector<1x1xf32>
    %58 = vector.broadcast %57 : vector<1x1xf32> to vector<1x8xf32>
    %59 = vector.broadcast %cst_31 : f32 to vector<1x8xf32>
    %60 = arith.select %56, %58, %59 : vector<1x8xi1>, vector<1x8xf32>
    %61 = arith.addf %54, %60 : vector<1x8xf32>
    %c3_i32 = arith.constant 3 : i32
    %62 = vector.broadcast %c3_i32 : i32 to vector<1x8xi32>
    %63 = arith.cmpi eq, %39, %62 : vector<1x8xi32>
    %cst_32 = arith.constant 0.000000e+00 : f32
    %64 = vector.shape_cast %30 : vector<1x1xf32> to vector<1x1xf32>
    %65 = vector.broadcast %64 : vector<1x1xf32> to vector<1x8xf32>
    %66 = vector.broadcast %cst_32 : f32 to vector<1x8xf32>
    %67 = arith.select %63, %65, %66 : vector<1x8xi1>, vector<1x8xf32>
    %68 = arith.addf %61, %67 : vector<1x8xf32>
    %c4_i32 = arith.constant 4 : i32
    %69 = vector.broadcast %c4_i32 : i32 to vector<1x8xi32>
    %70 = arith.cmpi eq, %39, %69 : vector<1x8xi32>
    %cst_33 = arith.constant 0.000000e+00 : f32
    %71 = vector.shape_cast %34 : vector<1x1xf32> to vector<1x1xf32>
    %72 = vector.broadcast %71 : vector<1x1xf32> to vector<1x8xf32>
    %73 = vector.broadcast %cst_33 : f32 to vector<1x8xf32>
    %74 = arith.select %70, %72, %73 : vector<1x8xi1>, vector<1x8xf32>
    %75 = arith.addf %68, %74 : vector<1x8xf32>
    %c5_i32 = arith.constant 5 : i32
    %76 = vector.broadcast %c5_i32 : i32 to vector<1x8xi32>
    %77 = arith.cmpi eq, %39, %76 : vector<1x8xi32>
    %cst_34 = arith.constant 0.000000e+00 : f32
    %78 = vector.shape_cast %38 : vector<1x1xf32> to vector<1x1xf32>
    %79 = vector.broadcast %78 : vector<1x1xf32> to vector<1x8xf32>
    %80 = vector.broadcast %cst_34 : f32 to vector<1x8xf32>
    %81 = arith.select %77, %79, %80 : vector<1x8xi1>, vector<1x8xf32>
    %82 = arith.addf %75, %81 : vector<1x8xf32>
    %83 = vector.shape_cast %82 : vector<1x8xf32> to vector<1x1x8xf32>
    %c0_35 = arith.constant 0 : index
    %c0_36 = arith.constant 0 : index
    %c0_37 = arith.constant 0 : index
    %84 = vector.load %arg7[%c0_35, %c0_36, %c0_37] : memref<1x1x8xf32, #tpu.memory_space<vmem>>, vector<1x1x8xf32>
    tpu.vector_store %arg7[%c0_35, %c0_36, %c0_37], %83 {strides = array<i32>} : memref<1x1x8xf32, #tpu.memory_space<vmem>>, vector<1x1x8xf32>,
    return
  }
  func.func @transform_0(%arg0: i32) -> (i32, i32, i32) {
    %c0_i32 = arith.constant 0 : i32
    %c0_i32_0 = arith.constant 0 : i32
    %c0_i32_1 = arith.constant 0 : i32
    return %arg0, %c0_i32, %c0_i32_0 : i32, i32, i32
  }
  func.func @transform_1(%arg0: i32) -> (i32, i32, i32) {
    %c0_i32 = arith.constant 0 : i32
    %c0_i32_0 = arith.constant 0 : i32
    %c0_i32_1 = arith.constant 0 : i32
    return %arg0, %c0_i32, %c0_i32_0 : i32, i32, i32
  }
  func.func @transform_2(%arg0: i32) -> (i32, i32) {
    %c0_i32 = arith.constant 0 : i32
    %c0_i32_0 = arith.constant 0 : i32
    %c0_i32_1 = arith.constant 0 : i32
    return %c0_i32, %c0_i32_0 : i32, i32
  }
  func.func @transform_3(%arg0: i32) -> (i32, i32) {
    %c0_i32 = arith.constant 0 : i32
    %c0_i32_0 = arith.constant 0 : i32
    %c0_i32_1 = arith.constant 0 : i32
    return %c0_i32, %c0_i32_0 : i32, i32
  }
  func.func @transform_4(%arg0: i32) -> (i32, i32) {
    %c0_i32 = arith.constant 0 : i32
    %c0_i32_0 = arith.constant 0 : i32
    %c0_i32_1 = arith.constant 0 : i32
    return %c0_i32, %c0_i32_0 : i32, i32
  }
  func.func @transform_5(%arg0: i32) -> (i32, i32) {
    %c0_i32 = arith.constant 0 : i32
    %c0_i32_0 = arith.constant 0 : i32
    %c0_i32_1 = arith.constant 0 : i32
    return %c0_i32, %c0_i32_0 : i32, i32
  }
  func.func @transform_6(%arg0: i32) -> (i32, i32, i32) {
    %c0_i32 = arith.constant 0 : i32
    %c0_i32_0 = arith.constant 0 : i32
    %c0_i32_1 = arith.constant 0 : i32
    return %arg0, %c0_i32, %c0_i32_0 : i32, i32, i32
  }
}

module attributes {stable_mosaic.version = 11 : i64} {
  func.func @kernel(%arg0: i32, %arg1: memref<1x8xf32, #tpu.memory_space<vmem>>, %arg2: memref<1x8x8xbf16, #tpu.memory_space<vmem>>, %arg3: memref<1x32x32xbf16, #tpu.memory_space<vmem>>, %arg4: memref<32x8xbf16, #tpu.memory_space<vmem>>, %arg5: memref<8x32xbf16, #tpu.memory_space<vmem>>, %arg6: memref<32x32xbf16, #tpu.memory_space<vmem>>, %arg7: memref<32x32xbf16, #tpu.memory_space<vmem>>, %arg8: memref<24x32xbf16, #tpu.memory_space<vmem>>, %arg9: memref<32x128xbf16, #tpu.memory_space<vmem>>, %arg10: memref<1x1x8xf32, #tpu.memory_space<vmem>>) attributes {dimension_semantics = [#tpu.dimension_semantics<parallel>], iteration_bounds = array<i64: 8>, scalar_prefetch = 0 : i64, scratch_operands = 0 : i64, tpu.core_type = #tpu.core_type<tc>, window_params = [{pipeline_mode = #tpu.pipeline_mode<synchronous>, transform_indices = @transform_0, window_bounds = array<i64: 1, 8>}, {transform_indices = @transform_1, window_bounds = array<i64: 1, 8, 8>}, {transform_indices = @transform_2, window_bounds = array<i64: 1, 32, 32>}, {pipeline_mode = #tpu.pipeline_mode<synchronous>, transform_indices = @transform_3, window_bounds = array<i64: 32, 8>}, {pipeline_mode = #tpu.pipeline_mode<synchronous>, transform_indices = @transform_4, window_bounds = array<i64: 8, 32>}, {pipeline_mode = #tpu.pipeline_mode<synchronous>, transform_indices = @transform_5, window_bounds = array<i64: 32, 32>}, {pipeline_mode = #tpu.pipeline_mode<synchronous>, transform_indices = @transform_6, window_bounds = array<i64: 32, 32>}, {pipeline_mode = #tpu.pipeline_mode<synchronous>, transform_indices = @transform_7, window_bounds = array<i64: 24, 32>}, {pipeline_mode = #tpu.pipeline_mode<synchronous>, transform_indices = @transform_8, window_bounds = array<i64: 32, 128>}, {transform_indices = @transform_9, window_bounds = array<i64: 1, 1, 8>}]} {
    %c0 = arith.constant 0 : index
    %c0_0 = arith.constant 0 : index
    %0 = vector.load %arg1[%c0, %c0_0] : memref<1x8xf32, #tpu.memory_space<vmem>>, vector<1x8xf32>
    %1 = vector.extract_strided_slice %0 {offsets = [0, 0], sizes = [1, 1], strides = [1, 1]} : vector<1x8xf32> to vector<1x1xf32>
    %2 = vector.extract_strided_slice %0 {offsets = [0, 1], sizes = [1, 1], strides = [1, 1]} : vector<1x8xf32> to vector<1x1xf32>
    %3 = vector.extract_strided_slice %0 {offsets = [0, 2], sizes = [1, 1], strides = [1, 1]} : vector<1x8xf32> to vector<1x1xf32>
    %4 = vector.extract_strided_slice %0 {offsets = [0, 3], sizes = [1, 1], strides = [1, 1]} : vector<1x8xf32> to vector<1x1xf32>
    %5 = vector.extract_strided_slice %0 {offsets = [0, 4], sizes = [1, 1], strides = [1, 1]} : vector<1x8xf32> to vector<1x1xf32>
    %c0_1 = arith.constant 0 : index
    %c0_2 = arith.constant 0 : index
    %c0_3 = arith.constant 0 : index
    %6 = vector.load %arg2[%c0_1, %c0_2, %c0_3] : memref<1x8x8xbf16, #tpu.memory_space<vmem>>, vector<1x8x8xbf16>
    %7 = vector.shape_cast %6 : vector<1x8x8xbf16> to vector<8x8xbf16>
    %c0_4 = arith.constant 0 : index
    %c0_5 = arith.constant 0 : index
    %c0_6 = arith.constant 0 : index
    %8 = vector.load %arg3[%c0_4, %c0_5, %c0_6] : memref<1x32x32xbf16, #tpu.memory_space<vmem>>, vector<1x32x32xbf16>
    %9 = vector.shape_cast %8 : vector<1x32x32xbf16> to vector<32x32xbf16>
    %c0_7 = arith.constant 0 : index
    %c0_8 = arith.constant 0 : index
    %10 = vector.load %arg4[%c0_7, %c0_8] : memref<32x8xbf16, #tpu.memory_space<vmem>>, vector<32x8xbf16>
    %c0_9 = arith.constant 0 : index
    %c0_10 = arith.constant 0 : index
    %11 = vector.load %arg5[%c0_9, %c0_10] : memref<8x32xbf16, #tpu.memory_space<vmem>>, vector<8x32xbf16>
    %cst = arith.constant dense<0.000000e+00> : vector<8x32xf32>
    %12 = tpu.matmul %7, %11, %cst {dimension_numbers = #tpu.dot_dimension_numbers<[1], [0], [0], [1], [0, 0, 1, 1], [], []>} : vector<8x8xbf16>, vector<8x32xbf16>, vector<8x32xf32> -> vector<8x32xf32>
    %13 = arith.truncf %12 : vector<8x32xf32> to vector<8x32xbf16>
    %cst_11 = arith.constant dense<0.000000e+00> : vector<32x32xf32>
    %14 = tpu.matmul %10, %13, %cst_11 {dimension_numbers = #tpu.dot_dimension_numbers<[1], [0], [0], [1], [0, 0, 1, 1], [], []>} : vector<32x8xbf16>, vector<8x32xbf16>, vector<32x32xf32> -> vector<32x32xf32>
    %15 = vector.broadcast %1 : vector<1x1xf32> to vector<32x32xf32>
    %16 = arith.subf %14, %15 : vector<32x32xf32>
    %17 = vector.broadcast %2 : vector<1x1xf32> to vector<32x32xf32>
    %18 = arith.mulf %16, %17 : vector<32x32xf32>
    %19 = vector.broadcast %3 : vector<1x1xf32> to vector<32x32xf32>
    %20 = arith.addf %18, %19 : vector<32x32xf32>
    %c0_12 = arith.constant 0 : index
    %c0_13 = arith.constant 0 : index
    %21 = vector.load %arg6[%c0_12, %c0_13] : memref<32x32xbf16, #tpu.memory_space<vmem>>, vector<32x32xbf16>
    %c0_14 = arith.constant 0 : index
    %c0_15 = arith.constant 0 : index
    %22 = vector.load %arg7[%c0_14, %c0_15] : memref<32x32xbf16, #tpu.memory_space<vmem>>, vector<32x32xbf16>
    %cst_16 = arith.constant dense<0.000000e+00> : vector<32x32xf32>
    %23 = tpu.matmul %9, %22, %cst_16 {dimension_numbers = #tpu.dot_dimension_numbers<[1], [0], [0], [1], [0, 0, 1, 1], [], []>} : vector<32x32xbf16>, vector<32x32xbf16>, vector<32x32xf32> -> vector<32x32xf32>
    %24 = arith.truncf %23 : vector<32x32xf32> to vector<32x32xbf16>
    %cst_17 = arith.constant dense<0.000000e+00> : vector<32x32xf32>
    %25 = tpu.matmul %21, %24, %cst_17 {dimension_numbers = #tpu.dot_dimension_numbers<[1], [0], [0], [1], [0, 0, 1, 1], [], []>} : vector<32x32xbf16>, vector<32x32xbf16>, vector<32x32xf32> -> vector<32x32xf32>
    %26 = arith.subf %25, %20 : vector<32x32xf32>
    %27 = arith.mulf %26, %26 : vector<32x32xf32>
    %cst_18 = arith.constant dense<0.000000e+00> : vector<32xf32>
    %28 = vector.multi_reduction <add>, %27, %cst_18 [1] : vector<32x32xf32> to vector<32xf32>
    %29 = vector.shape_cast %28 : vector<32xf32> to vector<32x1xf32>
    %cst_19 = arith.constant dense<0.000000e+00> : vector<1xf32>
    %30 = vector.multi_reduction <add>, %29, %cst_19 [0] : vector<32x1xf32> to vector<1xf32>
    %31 = vector.shape_cast %30 : vector<1xf32> to vector<1x1xf32>
    %c0_20 = arith.constant 0 : index
    %c0_21 = arith.constant 0 : index
    %32 = vector.load %arg8[%c0_20, %c0_21] : memref<24x32xbf16, #tpu.memory_space<vmem>>, vector<24x32xbf16>
    %c0_22 = arith.constant 0 : index
    %c0_23 = arith.constant 0 : index
    %33 = vector.load %arg9[%c0_22, %c0_23] : memref<32x128xbf16, #tpu.memory_space<vmem>>, vector<32x128xbf16>
    %34 = arith.truncf %25 : vector<32x32xf32> to vector<32x32xbf16>
    %cst_24 = arith.constant dense<0.000000e+00> : vector<24x32xf32>
    %35 = tpu.matmul %32, %34, %cst_24 {dimension_numbers = #tpu.dot_dimension_numbers<[1], [0], [0], [1], [0, 0, 1, 1], [], []>} : vector<24x32xbf16>, vector<32x32xbf16>, vector<24x32xf32> -> vector<24x32xf32>
    %36 = arith.truncf %35 : vector<24x32xf32> to vector<24x32xbf16>
    %cst_25 = arith.constant dense<0.000000e+00> : vector<24x128xf32>
    %37 = tpu.matmul %36, %33, %cst_25 {dimension_numbers = #tpu.dot_dimension_numbers<[1], [0], [0], [1], [0, 0, 1, 1], [], []>} : vector<24x32xbf16>, vector<32x128xbf16>, vector<24x128xf32> -> vector<24x128xf32>
    %38 = arith.truncf %20 : vector<32x32xf32> to vector<32x32xbf16>
    %cst_26 = arith.constant dense<0.000000e+00> : vector<24x32xf32>
    %39 = tpu.matmul %32, %38, %cst_26 {dimension_numbers = #tpu.dot_dimension_numbers<[1], [0], [0], [1], [0, 0, 1, 1], [], []>} : vector<24x32xbf16>, vector<32x32xbf16>, vector<24x32xf32> -> vector<24x32xf32>
    %40 = arith.truncf %39 : vector<24x32xf32> to vector<24x32xbf16>
    %cst_27 = arith.constant dense<0.000000e+00> : vector<24x128xf32>
    %41 = tpu.matmul %40, %33, %cst_27 {dimension_numbers = #tpu.dot_dimension_numbers<[1], [0], [0], [1], [0, 0, 1, 1], [], []>} : vector<24x32xbf16>, vector<32x128xbf16>, vector<24x128xf32> -> vector<24x128xf32>
    %42 = arith.mulf %37, %37 : vector<24x128xf32>
    %43 = arith.mulf %41, %41 : vector<24x128xf32>
    %44 = arith.mulf %37, %41 : vector<24x128xf32>
    %cst_28 = arith.constant 2.000000e+00 : f32
    %45 = vector.broadcast %cst_28 : f32 to vector<24x128xf32>
    %46 = arith.mulf %45, %44 : vector<24x128xf32>
    %47 = vector.broadcast %4 : vector<1x1xf32> to vector<24x128xf32>
    %48 = arith.addf %46, %47 : vector<24x128xf32>
    %49 = arith.mulf %25, %20 : vector<32x32xf32>
    %50 = arith.truncf %49 : vector<32x32xf32> to vector<32x32xbf16>
    %cst_29 = arith.constant dense<0.000000e+00> : vector<24x32xf32>
    %51 = tpu.matmul %32, %50, %cst_29 {dimension_numbers = #tpu.dot_dimension_numbers<[1], [0], [0], [1], [0, 0, 1, 1], [], []>} : vector<24x32xbf16>, vector<32x32xbf16>, vector<24x32xf32> -> vector<24x32xf32>
    %52 = arith.truncf %51 : vector<24x32xf32> to vector<24x32xbf16>
    %cst_30 = arith.constant dense<0.000000e+00> : vector<24x128xf32>
    %53 = tpu.matmul %52, %33, %cst_30 {dimension_numbers = #tpu.dot_dimension_numbers<[1], [0], [0], [1], [0, 0, 1, 1], [], []>} : vector<24x32xbf16>, vector<32x128xbf16>, vector<24x128xf32> -> vector<24x128xf32>
    %54 = arith.subf %53, %44 : vector<24x128xf32>
    %cst_31 = arith.constant 2.000000e+00 : f32
    %55 = vector.broadcast %cst_31 : f32 to vector<24x128xf32>
    %56 = arith.mulf %55, %54 : vector<24x128xf32>
    %57 = vector.broadcast %5 : vector<1x1xf32> to vector<24x128xf32>
    %58 = arith.addf %56, %57 : vector<24x128xf32>
    %59 = arith.mulf %48, %58 : vector<24x128xf32>
    %60 = arith.addf %42, %43 : vector<24x128xf32>
    %61 = vector.broadcast %4 : vector<1x1xf32> to vector<24x128xf32>
    %62 = arith.addf %60, %61 : vector<24x128xf32>
    %63 = arith.mulf %25, %25 : vector<32x32xf32>
    %64 = arith.truncf %63 : vector<32x32xf32> to vector<32x32xbf16>
    %cst_32 = arith.constant dense<0.000000e+00> : vector<24x32xf32>
    %65 = tpu.matmul %32, %64, %cst_32 {dimension_numbers = #tpu.dot_dimension_numbers<[1], [0], [0], [1], [0, 0, 1, 1], [], []>} : vector<24x32xbf16>, vector<32x32xbf16>, vector<24x32xf32> -> vector<24x32xf32>
    %66 = arith.truncf %65 : vector<24x32xf32> to vector<24x32xbf16>
    %cst_33 = arith.constant dense<0.000000e+00> : vector<24x128xf32>
    %67 = tpu.matmul %66, %33, %cst_33 {dimension_numbers = #tpu.dot_dimension_numbers<[1], [0], [0], [1], [0, 0, 1, 1], [], []>} : vector<24x32xbf16>, vector<32x128xbf16>, vector<24x128xf32> -> vector<24x128xf32>
    %68 = arith.subf %67, %42 : vector<24x128xf32>
    %69 = arith.mulf %20, %20 : vector<32x32xf32>
    %70 = arith.truncf %69 : vector<32x32xf32> to vector<32x32xbf16>
    %cst_34 = arith.constant dense<0.000000e+00> : vector<24x32xf32>
    %71 = tpu.matmul %32, %70, %cst_34 {dimension_numbers = #tpu.dot_dimension_numbers<[1], [0], [0], [1], [0, 0, 1, 1], [], []>} : vector<24x32xbf16>, vector<32x32xbf16>, vector<24x32xf32> -> vector<24x32xf32>
    %72 = arith.truncf %71 : vector<24x32xf32> to vector<24x32xbf16>
    %cst_35 = arith.constant dense<0.000000e+00> : vector<24x128xf32>
    %73 = tpu.matmul %72, %33, %cst_35 {dimension_numbers = #tpu.dot_dimension_numbers<[1], [0], [0], [1], [0, 0, 1, 1], [], []>} : vector<24x32xbf16>, vector<32x128xbf16>, vector<24x128xf32> -> vector<24x128xf32>
    %74 = arith.subf %73, %43 : vector<24x128xf32>
    %75 = arith.addf %68, %74 : vector<24x128xf32>
    %76 = vector.broadcast %5 : vector<1x1xf32> to vector<24x128xf32>
    %77 = arith.addf %75, %76 : vector<24x128xf32>
    %78 = arith.mulf %62, %77 : vector<24x128xf32>
    %79 = arith.divf %59, %78 : vector<24x128xf32>
    %80 = tpu.iota {dimensions = array<i32: 0>} : vector<24x128xi32>
    %81 = tpu.iota {dimensions = array<i32: 1>} : vector<24x128xi32>
    %c22_i32 = arith.constant 22 : i32
    %82 = vector.broadcast %c22_i32 : i32 to vector<24x128xi32>
    %83 = arith.cmpi slt, %80, %82 : vector<24x128xi32>
    %c22_i32_36 = arith.constant 22 : i32
    %84 = vector.broadcast %c22_i32_36 : i32 to vector<24x128xi32>
    %85 = arith.cmpi slt, %81, %84 : vector<24x128xi32>
    %86 = arith.andi %83, %85 : vector<24x128xi1>
    %cst_37 = arith.constant 0.000000e+00 : f32
    %87 = vector.broadcast %cst_37 : f32 to vector<24x128xf32>
    %88 = arith.select %86, %79, %87 : vector<24x128xi1>, vector<24x128xf32>
    %cst_38 = arith.constant dense<0.000000e+00> : vector<24xf32>
    %89 = vector.multi_reduction <add>, %88, %cst_38 [1] : vector<24x128xf32> to vector<24xf32>
    %90 = vector.shape_cast %89 : vector<24xf32> to vector<24x1xf32>
    %cst_39 = arith.constant dense<0.000000e+00> : vector<1xf32>
    %91 = vector.multi_reduction <add>, %90, %cst_39 [0] : vector<24x1xf32> to vector<1xf32>
    %92 = vector.shape_cast %91 : vector<1xf32> to vector<1x1xf32>
    %93 = tpu.iota {dimensions = array<i32: 1>} : vector<1x8xi32>
    %cst_40 = arith.constant 0.000000e+00 : f32
    %94 = vector.broadcast %cst_40 : f32 to vector<1x8xf32>
    %c0_i32 = arith.constant 0 : i32
    %95 = vector.broadcast %c0_i32 : i32 to vector<1x8xi32>
    %96 = arith.cmpi eq, %93, %95 : vector<1x8xi32>
    %cst_41 = arith.constant 0.000000e+00 : f32
    %97 = vector.shape_cast %31 : vector<1x1xf32> to vector<1x1xf32>
    %98 = vector.broadcast %97 : vector<1x1xf32> to vector<1x8xf32>
    %99 = vector.broadcast %cst_41 : f32 to vector<1x8xf32>
    %100 = arith.select %96, %98, %99 : vector<1x8xi1>, vector<1x8xf32>
    %101 = arith.addf %94, %100 : vector<1x8xf32>
    %c1_i32 = arith.constant 1 : i32
    %102 = vector.broadcast %c1_i32 : i32 to vector<1x8xi32>
    %103 = arith.cmpi eq, %93, %102 : vector<1x8xi32>
    %cst_42 = arith.constant 0.000000e+00 : f32
    %104 = vector.shape_cast %92 : vector<1x1xf32> to vector<1x1xf32>
    %105 = vector.broadcast %104 : vector<1x1xf32> to vector<1x8xf32>
    %106 = vector.broadcast %cst_42 : f32 to vector<1x8xf32>
    %107 = arith.select %103, %105, %106 : vector<1x8xi1>, vector<1x8xf32>
    %108 = arith.addf %101, %107 : vector<1x8xf32>
    %109 = vector.shape_cast %108 : vector<1x8xf32> to vector<1x1x8xf32>
    %c0_43 = arith.constant 0 : index
    %c0_44 = arith.constant 0 : index
    %c0_45 = arith.constant 0 : index
    %110 = vector.load %arg10[%c0_43, %c0_44, %c0_45] : memref<1x1x8xf32, #tpu.memory_space<vmem>>, vector<1x1x8xf32>
    tpu.vector_store %arg10[%c0_43, %c0_44, %c0_45], %109 {strides = array<i32>} : memref<1x1x8xf32, #tpu.memory_space<vmem>>, vector<1x1x8xf32>,
    return
  }
  func.func @transform_0(%arg0: i32) -> (i32, i32) {
    %c0_i32 = arith.constant 0 : i32
    %c0_i32_0 = arith.constant 0 : i32
    %c0_i32_1 = arith.constant 0 : i32
    return %c0_i32, %c0_i32_0 : i32, i32
  }
  func.func @transform_1(%arg0: i32) -> (i32, i32, i32) {
    %c0_i32 = arith.constant 0 : i32
    %c0_i32_0 = arith.constant 0 : i32
    %c0_i32_1 = arith.constant 0 : i32
    return %arg0, %c0_i32, %c0_i32_0 : i32, i32, i32
  }
  func.func @transform_2(%arg0: i32) -> (i32, i32, i32) {
    %c0_i32 = arith.constant 0 : i32
    %c0_i32_0 = arith.constant 0 : i32
    %c0_i32_1 = arith.constant 0 : i32
    return %arg0, %c0_i32, %c0_i32_0 : i32, i32, i32
  }
  func.func @transform_3(%arg0: i32) -> (i32, i32) {
    %c0_i32 = arith.constant 0 : i32
    %c0_i32_0 = arith.constant 0 : i32
    %c0_i32_1 = arith.constant 0 : i32
    return %c0_i32, %c0_i32_0 : i32, i32
  }
  func.func @transform_4(%arg0: i32) -> (i32, i32) {
    %c0_i32 = arith.constant 0 : i32
    %c0_i32_0 = arith.constant 0 : i32
    %c0_i32_1 = arith.constant 0 : i32
    return %c0_i32, %c0_i32_0 : i32, i32
  }
  func.func @transform_5(%arg0: i32) -> (i32, i32) {
    %c0_i32 = arith.constant 0 : i32
    %c0_i32_0 = arith.constant 0 : i32
    %c0_i32_1 = arith.constant 0 : i32
    return %c0_i32, %c0_i32_0 : i32, i32
  }
  func.func @transform_6(%arg0: i32) -> (i32, i32) {
    %c0_i32 = arith.constant 0 : i32
    %c0_i32_0 = arith.constant 0 : i32
    %c0_i32_1 = arith.constant 0 : i32
    return %c0_i32, %c0_i32_0 : i32, i32
  }
  func.func @transform_7(%arg0: i32) -> (i32, i32) {
    %c0_i32 = arith.constant 0 : i32
    %c0_i32_0 = arith.constant 0 : i32
    %c0_i32_1 = arith.constant 0 : i32
    return %c0_i32, %c0_i32_0 : i32, i32
  }
  func.func @transform_8(%arg0: i32) -> (i32, i32) {
    %c0_i32 = arith.constant 0 : i32
    %c0_i32_0 = arith.constant 0 : i32
    %c0_i32_1 = arith.constant 0 : i32
    return %c0_i32, %c0_i32_0 : i32, i32
  }
  func.func @transform_9(%arg0: i32) -> (i32, i32, i32) {
    %c0_i32 = arith.constant 0 : i32
    %c0_i32_0 = arith.constant 0 : i32
    %c0_i32_1 = arith.constant 0 : i32
    return %arg0, %c0_i32, %c0_i32_0 : i32, i32, i32
  }
}

</mosaic_0001>

<bundles_post_ra>
// kernel: ssq_spectral_loss.2
= control target key start
LH: loop header
LB: loop body
LE: loop exit
PB: predicated region body
PF: predicated region fallthrough
CT: control target
= control target key end

     0   :  { %s861_s21 = smov 0   ;;  %s935_s0 = inlined_call_operand.vmem [shape: bf16[8,8,8], index: 0, kind: input, shape index: {}]   ;;  %s936_s1 = inlined_call_operand.vmem [shape: bf16[8,32,32], index: 1, kind: input, shape index: {}]   ;;  %s937_s2 = inlined_call_operand.vmem [shape: bf16[32,8], index: 2, kind: input, shape index: {}]   ;;  %s938_s3 = inlined_call_operand.vmem [shape: bf16[8,32], index: 3, kind: input, shape index: {}]   ;;  %s939_s4 = inlined_call_operand.vmem [shape: bf16[32,32], index: 4, kind: input, shape index: {}]   ;;  %s940_s5 = inlined_call_operand.vmem [shape: bf16[32,32], index: 5, kind: input, shape index: {}]   ;;  %s941_s6 = inlined_call_operand.vmem [shape: f32[8,1,8], index: 6, kind: output, shape index: {}]  }
   0x1 LB: > { %s730_s22 = sadd.s32 4294967295, %s822_s21   ;;  %p734_p0 = scmp.ge.s32.totalorder %s822_s21, 1  ;;  %s822_s21 = sphi %s861_s21, %s16_s21  }
   0x2   : > { %p221_p1 = scmp.lt.s32.totalorder %s822_s21, 9 }
   0x4   : > { %p222_p2 = pnand %p734_p0, %p221_p1 }
   0x5   : > { %v275_v0 = vld [vmem:[%s938_s3] sm:$0xf] (!%p222_p2)  ;;  %vm280_vm0 = vcmask (!%p222_p2), 1043456   ;;  %p253_p3 = scmp.lt.s32.totalorder (!%p222_p2), %s730_s22, 7  ;;  %v824_v1 = vmov (!%p222_p2), 0.0   ;;  %vm825_vm1 = vmmov (!%p222_p2), 0  }
   0x6   : > { %225 = sbr.rel (%p222_p2) target bundleno = 639 (0x27f), region = 44  ;;  %769 = vmatprep.subr.bf16.mxu0 (!%p222_p2), %v824_v1  ;;  %v282_v2 = vsel (!%p222_p2), %vm280_vm0, %v275_v0, 0  ;;  %771 = vmatprep.mubr.msk.bf16.mxu0 (!%p222_p2), %vm825_vm1, %v824_v1  ;;  %v808_v3 = vld [vmem:[%s940_s5] sm:$0xff] (!%p222_p2)   ;;  %vm276_vm2 = vcmask (!%p222_p2), 64512   ;;  %v809_v4 = vld [vmem:[%s940_s5 + $0x8] sm:$0xff] (!%p222_p2)   ;;  %vm423_vm3 = vcmask (!%p222_p2), 261120  }
   0x7   : > { %770 = vmatpush3.bf16.msra.mxu0 (!%p222_p2), %v282_v2  ;;  %v812_v8 = vld [vmem:[%s937_s2] sm:$0xff] (!%p222_p2)   ;;  %v813_v18 = vld [vmem:[%s937_s2 + $0x8] sm:$0xff] (!%p222_p2)   ;;  %vm669_vm10 = vcmask (!%p222_p2), 57344  }
   0x8   : > { %781 = vmatprep.subr.bf16.mxu0 (!%p222_p2), %v808_v3  ;;  %777 = vmatprep.mubr.msk.bf16.mxu1 (!%p222_p2), %vm276_vm2, %v812_v8  ;;  %v814_v19 = vld [vmem:[%s939_s4] sm:$0xff] (!%p222_p2)   ;;  %v815_v26 = vld [vmem:[%s939_s4 + $0x8] sm:$0xff] (!%p222_p2)  }
   0xd   : > { %s943_s22 = smov (!%p253_p3, %s730_s22), 7 }
   0xe   : > { %s735_s27 = sshll.u32 %s943_s22, 2  ;;  %s755_s9 = sshll.u32 %s943_s22, 4 }
   0xf   : > { %s256_s8 = scalar_lea.vmem %s935_s0, %s735_s27  ;;  %s261_s12 = scalar_lea.vmem %s936_s1, %s755_s9 }
  0x10   : > { %v266_v5 = vld [vmem:[%s256_s8] sm:$0xf]  ;;  %v811_v7 = vld [vmem:[%s261_s12 + $0x8] sm:$0xff]   ;;  %s264_s25 = scalar_lea.vmem %s941_s6, %s943_s22 }
  0x11   : > { %772 = vmatmul.mubr.msk.bf16.vlgmr.msra.gmra.mrb[0].mxu0 %vm276_vm2, %v266_v5  ;;  %v810_v6 = vld [vmem:[%s261_s12] sm:$0xff]   ;;  %v546_v9 = vunpack.c.l.bf16 %v266_v5 }
  0x12   : > { %782 = vmatpush3.bf16.msra.mxu0 %v808_v3  ;;  %785 = vmatprep.mubr.msk.bf16.mxu0 %vm423_vm3, %v810_v6 }
  0x13   : > { %783 = vmatprep.subr.bf16.mxu0 %v809_v4  ;;  %v556_v10 = vsel %vm276_vm2, %v546_v9, -inf  ;;  %v547_v11 = vsel %vm276_vm2, %v546_v9, inf }
  0x14   : > { %557 = vmax.xlane.f32.xlu1 %v556_v10  ;;  %548 = vmin.xlane.f32.xlu0 %v547_v11 }
  0x16   : > { %784 = vmatpush3.bf16.msra.mxu0 %v809_v4 }
  0x19   : > { %786 = vmatmul.mubr.msk.bf16.vlgmr.msra.gmra.mrb[4].mxu0 %vm423_vm3, %v811_v7 }
  0xa1   : > { %v558_v51 = vpop.xlane.xlu1 %557  ;;  %v549_v52 = vpop.xlane.xlu0 %548 }
  0xa2   : > { %v559_v57 = vrot.slane %v558_v51, 4  ;;  %v550_v58 = vrot.slane %v549_v52, 4 }
  0xa4   : > { %v560_v61 = vmax.f32 %v558_v51, %v559_v57  ;;  %v551_v62 = vmin.f32 %v549_v52, %v550_v58 }
  0xa6   : > { %v561_v8 = vrot.slane %v560_v61, 2  ;;  %v552_v9 = vrot.slane %v551_v62, 2 }
  0xe4   : > { %v318_v12 = vpop.f32.mrb[0].mxu0 }
  0xe5   : > { %v324_v13 = vpack.c.bf16 %v318_v12, %v318_v12  ;;  %v773_v14 = vpop.f32.mrb[1].mxu0 }
  0xe6   : > { %v321_v15 = vpop.f32.mrb[2].mxu0 }
  0xe7   : > { %v774_v16 = vpop.f32.mrb[3].mxu0  ;;  %797 = vmatprep.subr.msk.bf16.mxu1 %vm280_vm0, %v324_v13  ;;  %v342_v17 = vsel %vm280_vm0, %v324_v13, 0  ;;  %v649_v15 = vlaneseq }
  0xe8   : > { %776 = vmatpush3.bf16.msra.mxu1 %v342_v17  ;;  %v562_v16 = vmax.f32 %v560_v61, %v561_v8  ;;  %v553_v17 = vmin.f32 %v551_v62, %v552_v9 }
  0xeb   : > { %778 = vmatmul.mubr.msk.bf16.vlgmr.msra.gmra.mrb[0].mxu1 %vm276_vm2, %v813_v18 }
  0xec   : > { %v787_v20 = vpop.f32.mrb[4].mxu0  ;;  %793 = vmatprep.mubr.msk.bf16.mxu1 %vm423_vm3, %v814_v19 }
  0xed   : > { %v464_v21 = vpop.f32.mrb[5].mxu0 }
  0xee   : > { %v788_v22 = vpop.f32.mrb[6].mxu0 }
  0xef   : > { %v480_v23 = vpack.c.bf16 %v788_v22, %v787_v20  ;;  %v467_v24 = vpop.f32.mrb[7].mxu0 }
  0xf0   : > { %v479_v25 = vpack.c.bf16 %v467_v24, %v464_v21 }
  0xf2   : > { %789 = vmatprep.subr.bf16.mxu1 %v479_v25 }
  0xf3   : > { %790 = vmatpush3.bf16.msra.mxu1 %v479_v25 }
  0xf4   : > { %791 = vmatprep.subr.bf16.mxu1 %v480_v23 }
  0xf7   : > { %792 = vmatpush3.bf16.msra.mxu1 %v480_v23 }
  0xfa   : > { %794 = vmatmul.mubr.msk.bf16.vlgmr.msra.gmra.mrb[4].mxu1 %vm423_vm3, %v815_v26  ;;  %v650_v26 = vand.u32 127, %v649_v15 }
  0xfc   : > { %vm654_vm4 = vcmp.eq.s32.totalorder %v650_v26, 1  ;;  %vm651_vm5 = vcmp.eq.s32.totalorder %v650_v26, 0  ;;  %vm657_vm6 = vcmp.eq.s32.totalorder %v650_v26, 2  ;;  %vm660_vm7 = vcmp.eq.s32.totalorder %v650_v26, 3 }
  0xfd   : > { %vm663_vm8 = vcmp.eq.s32.totalorder %v650_v26, 4  ;;  %vm666_vm9 = vcmp.eq.s32.totalorder %v650_v26, 5 }
 0x1be   : > { %v779_v27 = vpop.f32.mrb[0].mxu1 }
 0x1bf   : > { %v378_v28 = vpop.f32.mrb[1].mxu1  ;;  %v592_v29 = vsel %vm423_vm3, %v779_v27, -inf  ;;  %v571_v30 = vsel %vm423_vm3, %v779_v27, inf  ;;  %v563_v27 = vrot.slane %v562_v16, 1 }
 0x1c0   : > { %593 = vmax.xlane.f32.xlu0 %v592_v29  ;;  %572 = vmin.xlane.f32.xlu1 %v571_v30  ;;  %v780_v31 = vpop.f32.mrb[2].mxu1  ;;  %v565_v33 = vsel %vm423_vm3, %v378_v28, inf  ;;  %v586_v35 = vsel %vm423_vm3, %v378_v28, -inf  ;;  %v554_v28 = vrot.slane %v553_v17, 1 }
 0x1c1   : > { %v381_v32 = vpop.f32.mrb[3].mxu1  ;;  %v574_v34 = vsel %vm423_vm3, %v780_v31, inf  ;;  %v595_v36 = vsel %vm423_vm3, %v780_v31, -inf }
 0x1c2   : > { %v589_v37 = vsel %vm423_vm3, %v381_v32, -inf  ;;  %v568_v38 = vsel %vm423_vm3, %v381_v32, inf }
 0x1c4   : > { %566 = vmin.xlane.f32.xlu0 %v565_v33  ;;  %575 = vmin.xlane.f32.xlu1 %v574_v34 }
 0x1c8   : > { %587 = vmax.xlane.f32.xlu0 %v586_v35  ;;  %596 = vmax.xlane.f32.xlu1 %v595_v36  ;;  %v564_v35 = vmax.f32 %v562_v16, %v563_v27  ;;  %v555_v36 = vmin.f32 %v553_v17, %v554_v28 }
 0x1cc   : > { %590 = vmax.xlane.f32.xlu1 %v589_v37  ;;  %569 = vmin.xlane.f32.xlu0 %v568_v38 }
 0x1cd   : > { %v795_v39 = vpop.f32.mrb[4].mxu1 }
 0x1ce   : > { %v531_v40 = vpop.f32.mrb[5].mxu1  ;;  %v613_v41 = vsel %vm423_vm3, %v795_v39, inf  ;;  %v634_v49 = vsel %vm423_vm3, %v795_v39, -inf }
 0x1cf   : > { %v796_v42 = vpop.f32.mrb[6].mxu1  ;;  %v607_v45 = vsel %vm423_vm3, %v531_v40, inf  ;;  %v628_v47 = vsel %vm423_vm3, %v531_v40, -inf }
 0x1d0   : > { %614 = vmin.xlane.f32.xlu0 %v613_v41  ;;  %v534_v43 = vpop.f32.mrb[7].mxu1  ;;  %v616_v44 = vsel %vm423_vm3, %v796_v42, inf  ;;  %v637_v50 = vsel %vm423_vm3, %v796_v42, -inf }
 0x1d1   : > { %617 = vmin.xlane.f32.xlu1 %v616_v44  ;;  %v610_v46 = vsel %vm423_vm3, %v534_v43, inf  ;;  %v631_v48 = vsel %vm423_vm3, %v534_v43, -inf }
 0x1d4   : > { %608 = vmin.xlane.f32.xlu0 %v607_v45  ;;  %v655_v45 = vsel %vm654_vm4, %v564_v35, 0.0 }
 0x1d5   : > { %611 = vmin.xlane.f32.xlu1 %v610_v46  ;;  %v652_v46 = vsel %vm651_vm5, %v555_v36, 0.0 }
 0x1d6   : > { %v656_v52 = vadd.f32 %v655_v45, %v652_v46 }
 0x1d8   : > { %629 = vmax.xlane.f32.xlu0 %v628_v47 }
 0x1d9   : > { %632 = vmax.xlane.f32.xlu1 %v631_v48 }
 0x1dc   : > { %635 = vmax.xlane.f32.xlu0 %v634_v49 }
 0x1dd   : > { %638 = vmax.xlane.f32.xlu1 %v637_v50 }
 0x24d   : > { %v594_v53 = vpop.xlane.xlu0 %593  ;;  %v573_v54 = vpop.xlane.xlu1 %572 }
 0x251   : > { %v567_v55 = vpop.xlane.xlu0 %566  ;;  %v576_v56 = vpop.xlane.xlu1 %575 }
 0x252   : > { %v578_v1 = vmin.f32 %v573_v54, %v576_v56 }
 0x255   : > { %v588_v59 = vpop.xlane.xlu0 %587  ;;  %v597_v60 = vpop.xlane.xlu1 %596 }
 0x256   : > { %v599_v2 = vmax.f32 %v594_v53, %v597_v60 }
 0x259   : > { %v591_v63 = vpop.xlane.xlu1 %590  ;;  %v570_v0 = vpop.xlane.xlu0 %569 }
 0x25a   : > { %v598_v3 = vmax.f32 %v588_v59, %v591_v63  ;;  %v577_v4 = vmin.f32 %v567_v55, %v570_v0 }
 0x25c   : > { %v600_v5 = vmax.f32 %v598_v3, %v599_v2  ;;  %v579_v6 = vmin.f32 %v577_v4, %v578_v1 }
 0x25d   : > { %v615_v7 = vpop.xlane.xlu0 %614 }
 0x25e   : > { %v580_v10 = vrot.slane %v579_v6, 4  ;;  %v618_v11 = vpop.xlane.xlu1 %617  ;;  %v601_v12 = vrot.slane %v600_v5, 4 }
 0x25f   : > { %v620_v21 = vmin.f32 %v615_v7, %v618_v11 }
 0x260   : > { %v581_v13 = vmin.f32 %v579_v6, %v580_v10  ;;  %v602_v20 = vmax.f32 %v600_v5, %v601_v12 }
 0x261   : > { %v609_v14 = vpop.xlane.xlu0 %608 }
 0x262   : > { %v582_v18 = vrot.slane %v581_v13, 2  ;;  %v612_v19 = vpop.xlane.xlu1 %611  ;;  %v603_v30 = vrot.slane %v602_v20, 2 }
 0x263   : > { %v619_v22 = vmin.f32 %v609_v14, %v612_v19 }
 0x264   : > { %v583_v23 = vmin.f32 %v581_v13, %v582_v18  ;;  %v604_v38 = vmax.f32 %v602_v20, %v603_v30 }
 0x265   : > { %v621_v24 = vmin.f32 %v619_v22, %v620_v21  ;;  %v630_v25 = vpop.xlane.xlu0 %629 }
 0x266   : > { %v633_v29 = vpop.xlane.xlu1 %632  ;;  %v584_v32 = vrot.slane %v583_v23, 1  ;;  %v605_v47 = vrot.slane %v604_v38, 1 }
 0x267   : > { %v622_v31 = vrot.slane %v621_v24, 4  ;;  %v640_v40 = vmax.f32 %v630_v25, %v633_v29 }
 0x268   : > { %v585_v42 = vmin.f32 %v583_v23, %v584_v32  ;;  %v606_v53 = vmax.f32 %v604_v38, %v605_v47 }
 0x269   : > { %v623_v33 = vmin.f32 %v621_v24, %v622_v31  ;;  %v636_v34 = vpop.xlane.xlu0 %635 }
 0x26a   : > { %v639_v37 = vpop.xlane.xlu1 %638  ;;  %v658_v50 = vsel %vm657_vm6, %v585_v42, 0.0  ;;  %v661_v58 = vsel %vm660_vm7, %v606_v53, 0.0 }
 0x26b   : > { %v624_v39 = vrot.slane %v623_v33, 2  ;;  %v641_v41 = vmax.f32 %v636_v34, %v639_v37  ;;  %v659_v56 = vadd.f32 %v658_v50, %v656_v52 }
 0x26d   : > { %v625_v43 = vmin.f32 %v623_v33, %v624_v39  ;;  %v642_v44 = vmax.f32 %v640_v40, %v641_v41  ;;  %v662_v61 = vadd.f32 %v661_v58, %v659_v56 }
 0x26f   : > { %v626_v48 = vrot.slane %v625_v43, 1  ;;  %v643_v49 = vrot.slane %v642_v44, 4 }
 0x271   : > { %v644_v51 = vmax.f32 %v642_v44, %v643_v49  ;;  %v627_v54 = vmin.f32 %v625_v43, %v626_v48 }
 0x273   : > { %v645_v55 = vrot.slane %v644_v51, 2  ;;  %v664_v59 = vsel %vm663_vm8, %v627_v54, 0.0 }
 0x274   : > { %v665_v63 = vadd.f32 %v664_v59, %v662_v61 }
 0x275   : > { %v646_v57 = vmax.f32 %v644_v51, %v645_v55 }
 0x277   : > { %v647_v60 = vrot.slane %v646_v57, 1 }
 0x279   : > { %v648_v62 = vmax.f32 %v646_v57, %v647_v60 }
 0x27b   : > { %v667_v0 = vsel %vm666_vm9, %v648_v62, 0.0 }
 0x27c   : > { %v668_v1 = vadd.f32 %v667_v0, %v665_v63 }
 0x27e   : > { %670 = vst.msk [vmem:[%s264_s25] sm:$0x1] %vm669_vm10, %v668_v1 }
 0x27f PF: > { %s16_s21 = sadd.s32 1, %s822_s21  }
 0x280   : > { %p13_p4 = scmp.ge.s32.totalorder %s16_s21, 10  }
 0x282   :  { %15 = sbr.rel (!%p13_p4) target bundleno = 1 (0x1), region = 77 }

// kernel: ssq_spectral_loss.3
= control target key start
LH: loop header
LB: loop body
LE: loop exit
PB: predicated region body
PF: predicated region fallthrough
CT: control target
= control target key end

     0   :  { %s1737_s30 = smov 0   ;;  %s1859_s0 = inlined_call_operand.vmem [shape: f32[1,8], index: 0, kind: input, shape index: {}]   ;;  %s1860_s1 = inlined_call_operand.vmem [shape: bf16[8,8,8], index: 1, kind: input, shape index: {}]   ;;  %s1861_s2 = inlined_call_operand.vmem [shape: bf16[8,32,32], index: 2, kind: input, shape index: {}]   ;;  %s1862_s3 = inlined_call_operand.vmem [shape: bf16[32,8], index: 3, kind: input, shape index: {}]   ;;  %s1863_s4 = inlined_call_operand.vmem [shape: bf16[8,32], index: 4, kind: input, shape index: {}]   ;;  %s1864_s5 = inlined_call_operand.vmem [shape: bf16[32,32], index: 5, kind: input, shape index: {}]   ;;  %s1865_s6 = inlined_call_operand.vmem [shape: bf16[32,32], index: 6, kind: input, shape index: {}]   ;;  %s1866_s7 = inlined_call_operand.vmem [shape: bf16[24,32], index: 7, kind: input, shape index: {}]   ;;  %s1867_s8 = inlined_call_operand.vmem [shape: bf16[32,128], index: 8, kind: input, shape index: {}]   ;;  %s1868_s9 = inlined_call_operand.vmem [shape: f32[8,1,8], index: 9, kind: output, shape index: {}]  }
   0x1 LB: > { %s1420_s10 = sadd.s32 4294967295, %s1678_s30   ;;  %p1424_p0 = scmp.ge.s32.totalorder %s1678_s30, 1  ;;  %s1678_s30 = sphi %s1737_s30, %s19_s30  }
   0x2   : > { %p296_p1 = scmp.lt.s32.totalorder %s1678_s30, 9 }
   0x4   : > { %p297_p2 = pnand %p1424_p0, %p296_p1 }
   0x5   : > { %v357_v0 = vld [vmem:[%s1863_s4] sm:$0xf] (!%p297_p2)  ;;  %vm362_vm0 = vcmask (!%p297_p2), 1043456   ;;  %p334_p3 = scmp.lt.s32.totalorder (!%p297_p2), %s1420_s10, 7  ;;  %v1680_v1 = vmov (!%p297_p2), 0.0   ;;  %vm1681_vm1 = vmmov (!%p297_p2), 0  }
   0x6   : > { %300 = sbr.rel (%p297_p2) target bundleno = 1126 (0x466), region = 56  ;;  %1524 = vmatprep.subr.bf16.mxu0 (!%p297_p2), %v1680_v1  ;;  %v364_v2 = vsel (!%p297_p2), %vm362_vm0, %v357_v0, 0  ;;  %1526 = vmatprep.mubr.msk.bf16.mxu0 (!%p297_p2), %vm1681_vm1, %v1680_v1  ;;  %v1654_v3 = vld [vmem:[%s1865_s6] sm:$0xff] (!%p297_p2)   ;;  %vm358_vm2 = vcmask (!%p297_p2), 64512   ;;  %v1655_v4 = vld [vmem:[%s1865_s6 + $0x8] sm:$0xff] (!%p297_p2)   ;;  %vm534_vm3 = vcmask (!%p297_p2), 261120  }
   0x7   : > { %1525 = vmatpush3.bf16.msra.mxu0 (!%p297_p2), %v364_v2  ;;  %v1658_v8 = vld [vmem:[%s1862_s3] sm:$0xff] (!%p297_p2)   ;;  %v1682_v10 = vmov (!%p297_p2), 0   ;;  %v1683_v11 = vmov (!%p297_p2), 2   ;;  %v1684_v12 = vmov (!%p297_p2), 1   ;;  %v1685_v13 = vmov (!%p297_p2), 3   ;;  %v1659_v21 = vld [vmem:[%s1862_s3 + $0x8] sm:$0xff] (!%p297_p2)  }
   0x8   : > { %1536 = vmatprep.subr.bf16.mxu0 (!%p297_p2), %v1654_v3  ;;  %1532 = vmatprep.mubr.msk.bf16.mxu1 (!%p297_p2), %vm358_vm2, %v1658_v8  ;;  %v1433_v9 = vld [vmem:[%s1859_s0] ss:$0 sm:$0xff] (!%p297_p2)  ;;  %v1686_v14 = vmov (!%p297_p2), 4   ;;  %v1661_v29 = vld [vmem:[%s1864_s5 + $0x8] sm:$0xff] (!%p297_p2)   ;;  %vm1359_vm9 = vcmask (!%p297_p2), 57344  }
   0x9   : > { %1648 = vset.pattern.permute.xlu0 (!%p297_p2), %v1682_v10  ;;  %1650 = vset.pattern.permute.xlu1 (!%p297_p2), %v1683_v11  ;;  %v1660_v22 = vld [vmem:[%s1864_s5] sm:$0xff] (!%p297_p2)  }
   0xa   : > { %481 = vperm.xlu0 (!%p297_p2), %1648, %v1433_v9   ;;  %497 = vperm.xlu1 (!%p297_p2), %1650, %v1433_v9   ;;  %v1792_v30 = vld [vmem:[%s1866_s7] sm:$0xff] (!%p297_p2)  }
   0xd   : > { %s1870_s10 = smov (!%p334_p3, %s1420_s10), 7 }
   0xe   : > { %s1425_s15 = sshll.u32 %s1870_s10, 2  ;;  %s1470_s21 = sshll.u32 %s1870_s10, 4  ;;  %1649 = vset.pattern.permute.xlu0 %v1684_v12  ;;  %1651 = vset.pattern.permute.xlu1 %v1685_v13 }
   0xf   : > { %s337_s20 = scalar_lea.vmem %s1860_s1, %s1425_s15  ;;  %s342_s24 = scalar_lea.vmem %s1861_s2, %s1470_s21  ;;  %489 = vperm.xlu0 %1649, %v1433_v9   ;;  %944 = vperm.xlu1 %1651, %v1433_v9  }
  0x10   : > { %v348_v5 = vld [vmem:[%s337_s20] sm:$0xf]  ;;  %v1657_v7 = vld [vmem:[%s342_s24 + $0x8] sm:$0xff]   ;;  %s345_s26 = scalar_lea.vmem %s1868_s9, %s1870_s10 }
  0x11   : > { %1527 = vmatmul.mubr.msk.bf16.vlgmr.msra.gmra.mrb[0].mxu0 %vm358_vm2, %v348_v5  ;;  %v1656_v6 = vld [vmem:[%s342_s24] sm:$0xff]  }
  0x12   : > { %1537 = vmatpush3.bf16.msra.mxu0 %v1654_v3  ;;  %1540 = vmatprep.mubr.msk.bf16.mxu0 %vm534_vm3, %v1656_v6 }
  0x13   : > { %1538 = vmatprep.subr.bf16.mxu0 %v1655_v4  ;;  %1652 = vset.pattern.permute.xlu1 %v1686_v14 }
  0x14   : > { %1653 = vset.pattern.permute.xlu0 %v1686_v14  ;;  %1067 = vperm.xlu1 %1652, %v1433_v9  }
  0x16   : > { %1539 = vmatpush3.bf16.msra.mxu0 %v1655_v4 }
  0x19   : > { %1541 = vmatmul.mubr.msk.bf16.vlgmr.msra.gmra.mrb[4].mxu0 %vm534_vm3, %v1657_v7 }
  0x1a   : > { %1556 = vmatprep.mubr.msk.bf16.mxu0 %vm534_vm3, %v1792_v30 }
  0x89   : > { %v482_v31 = vpop.permute.xlu0 %481  ;;  %v498_v38 = vpop.permute.xlu1 %497 }
  0x8e   : > { %v490_v33 = vpop.permute.xlu0 %489 }
  0xe4   : > { %v400_v15 = vpop.f32.mrb[0].mxu0 }
  0xe5   : > { %v406_v16 = vpack.c.bf16 %v400_v15, %v400_v15  ;;  %v1528_v17 = vpop.f32.mrb[1].mxu0 }
  0xe6   : > { %v403_v18 = vpop.f32.mrb[2].mxu0 }
  0xe7   : > { %v1529_v19 = vpop.f32.mrb[3].mxu0  ;;  %1632 = vmatprep.subr.msk.bf16.mxu1 %vm362_vm0, %v406_v16  ;;  %v424_v20 = vsel %vm362_vm0, %v406_v16, 0 }
  0xe8   : > { %1531 = vmatpush3.bf16.msra.mxu1 %v424_v20 }
  0xeb   : > { %1533 = vmatmul.mubr.msk.bf16.vlgmr.msra.gmra.mrb[0].mxu1 %vm358_vm2, %v1659_v21 }
  0xec   : > { %v1542_v23 = vpop.f32.mrb[4].mxu0  ;;  %1548 = vmatprep.mubr.msk.bf16.mxu1 %vm534_vm3, %v1660_v22  ;;  %v1663_v22 = vld [vmem:[%s1866_s7 + $0x8] ss:$0 sps:$4 sm:$0xff]  }
  0xed   : > { %v575_v24 = vpop.f32.mrb[5].mxu0 }
  0xee   : > { %v1543_v25 = vpop.f32.mrb[6].mxu0 }
  0xef   : > { %v591_v26 = vpack.c.bf16 %v1543_v25, %v1542_v23  ;;  %v578_v27 = vpop.f32.mrb[7].mxu0  ;;  %v1815_v23 = vld [vmem:[%s1867_s8] sm:$0xff]  }
  0xf0   : > { %v590_v28 = vpack.c.bf16 %v578_v27, %v575_v24  ;;  %v1665_v24 = vld [vmem:[%s1867_s8 + $0x8] sm:$0xff]  }
  0xf2   : > { %1544 = vmatprep.subr.bf16.mxu1 %v590_v28 }
  0xf3   : > { %1545 = vmatpush3.bf16.msra.mxu1 %v590_v28 }
  0xf4   : > { %1546 = vmatprep.subr.bf16.mxu1 %v591_v26 }
  0xf7   : > { %1547 = vmatpush3.bf16.msra.mxu1 %v591_v26 }
  0xf8   : > { %1560 = vmatprep.subr.bf16.mxu1 %v1815_v23 }
  0xfa   : > { %1549 = vmatmul.mubr.msk.bf16.vlgmr.msra.gmra.mrb[4].mxu1 %vm534_vm3, %v1661_v29 }
  0xfb   : > { %1561 = vmatpush3.bf16.msra.mxu1 %v1815_v23 }
  0xfc   : > { %1562 = vmatprep.subr.bf16.mxu1 %v1665_v24 }
  0xff   : > { %1563 = vmatpush3.bf16.msra.mxu1 %v1665_v24 }
 0x100   : > { %1576 = vmatprep.subr.bf16.mxu1 %v1815_v23 }
 0x1be   : > { %v1534_v32 = vpop.f32.mrb[0].mxu1 }
 0x1bf   : > { %v486_v34 = vsub.f32 %v1534_v32, %v482_v31  ;;  %v460_v35 = vpop.f32.mrb[1].mxu1 }
 0x1c0   : > { %v484_v36 = vsub.f32 %v460_v35, %v482_v31  ;;  %v1535_v37 = vpop.f32.mrb[2].mxu1 }
 0x1c1   : > { %v487_v39 = vsub.f32 %v1535_v37, %v482_v31  ;;  %v463_v40 = vpop.f32.mrb[3].mxu1  ;;  %v494_v41 = vmul.f32 %v490_v33, %v486_v34 }
 0x1c2   : > { %v485_v42 = vsub.f32 %v463_v40, %v482_v31  ;;  %v492_v43 = vmul.f32 %v490_v33, %v484_v36 }
 0x1c3   : > { %v495_v44 = vmul.f32 %v490_v33, %v487_v39  ;;  %v502_v45 = vadd.f32 %v498_v38, %v494_v41 }
 0x1c4   : > { %v493_v46 = vmul.f32 %v490_v33, %v485_v42  ;;  %v500_v47 = vadd.f32 %v498_v38, %v492_v43 }
 0x1c5   : > { %v503_v48 = vadd.f32 %v498_v38, %v495_v44  ;;  %v1197_v49 = vmul.f32 %v502_v45, %v502_v45 }
 0x1c6   : > { %v501_v50 = vadd.f32 %v498_v38, %v493_v46  ;;  %v1195_v51 = vmul.f32 %v500_v47, %v500_v47 }
 0x1c7   : > { %v826_v52 = vpack.c.bf16 %v503_v48, %v502_v45  ;;  %v1198_v53 = vmul.f32 %v503_v48, %v503_v48 }
 0x1c8   : > { %v825_v54 = vpack.c.bf16 %v501_v50, %v500_v47  ;;  %v1196_v55 = vmul.f32 %v501_v50, %v501_v50 }
 0x1c9   : > { %v1796_v56 = vpack.c.bf16 %v1198_v53, %v1197_v49 }
 0x1ca   : > { %v1199_v57 = vpack.c.bf16 %v1196_v55, %v1195_v51 }
 0x1cd   : > { %v1550_v58 = vpop.f32.mrb[4].mxu1 }
 0x1ce   : > { %v952_v59 = vmul.f32 %v1550_v58, %v502_v45  ;;  %v642_v60 = vpop.f32.mrb[5].mxu1  ;;  %v659_v61 = vsub.f32 %v1550_v58, %v502_v45  ;;  %v1084_v62 = vmul.f32 %v1550_v58, %v1550_v58 }
 0x1cf   : > { %v950_v63 = vmul.f32 %v642_v60, %v500_v47  ;;  %v1082_v0 = vmul.f32 %v642_v60, %v642_v60  ;;  %v1551_v1 = vpop.f32.mrb[6].mxu1  ;;  %v657_v2 = vsub.f32 %v642_v60, %v500_v47 }
 0x1d0   : > { %v953_v3 = vmul.f32 %v1551_v1, %v503_v48  ;;  %v1085_v4 = vmul.f32 %v1551_v1, %v1551_v1  ;;  %v645_v5 = vpop.f32.mrb[7].mxu1  ;;  %v663_v6 = vmul.f32 %v659_v61, %v659_v61  ;;  %v694_v7 = vpack.c.bf16 %v1551_v1, %v1550_v58 }
 0x1d1   : > { %v951_v8 = vmul.f32 %v645_v5, %v501_v50  ;;  %v1083_v9 = vmul.f32 %v645_v5, %v645_v5  ;;  %v693_v10 = vpack.c.bf16 %v645_v5, %v642_v60  ;;  %v658_v11 = vsub.f32 %v645_v5, %v501_v50 }
 0x1d2   : > { %v671_v12 = vsel %vm534_vm3, %v663_v6, 0.0  ;;  %v661_v13 = vmul.f32 %v657_v2, %v657_v2  ;;  %v955_v14 = vpack.c.bf16 %v953_v3, %v952_v59  ;;  %v1087_v15 = vpack.c.bf16 %v1085_v4, %v1084_v62 }
 0x1d3   : > { %672 = vadd.xlane.f32.xlu0 %v671_v12  ;;  %1552 = vmatprep.subr.bf16.mxu0 %v693_v10  ;;  %v662_v16 = vmul.f32 %v658_v11, %v658_v11  ;;  %v954_v17 = vpack.c.bf16 %v951_v8, %v950_v63  ;;  %v1086_v18 = vpack.c.bf16 %v1083_v9, %v1082_v0 }
 0x1d4   : > { %1553 = vmatpush3.bf16.msra.mxu0 %v693_v10  ;;  %v1799_v19 = vsub.f32 %v1551_v1, %v503_v48  ;;  %v665_v21 = vsel %vm534_vm3, %v661_v13, 0.0  ;;  %v945_v10 = vpop.permute.xlu1 %944 }
 0x1d5   : > { %1554 = vmatprep.subr.bf16.mxu0 %v694_v7  ;;  %v668_v20 = vsel %vm534_vm3, %v662_v16, 0.0 }
 0x1d6   : > { %669 = vadd.xlane.f32.xlu1 %v668_v20 }
 0x1d7   : > { %666 = vadd.xlane.f32.xlu0 %v665_v21 }
 0x1d8   : > { %1555 = vmatpush3.bf16.msra.mxu0 %v694_v7 }
 0x1d9   : > { %1568 = vmatprep.subr.bf16.mxu0 %v825_v54 }
 0x1db   : > { %1557 = vmatmul.mubr.msk.bf16.vlgmr.msra.gmra.mrb[8].mxu0 %vm534_vm3, %v1663_v22 }
 0x1dc   : > { %1569 = vmatpush3.bf16.msra.mxu0 %v825_v54  ;;  %1572 = vmatprep.mubr.msk.bf16.mxu0 %vm534_vm3, %v1792_v30 }
 0x1dd   : > { %1570 = vmatprep.subr.bf16.mxu0 %v826_v52 }
 0x1e0   : > { %1571 = vmatpush3.bf16.msra.mxu0 %v826_v52 }
 0x1e1   : > { %1584 = vmatprep.subr.bf16.mxu0 %v954_v17 }
 0x1e3   : > { %1573 = vmatmul.mubr.msk.bf16.vlgmr.msra.gmra.mrb[12].mxu0 %vm534_vm3, %v1663_v22 }
 0x1e4   : > { %1585 = vmatpush3.bf16.msra.mxu0 %v954_v17  ;;  %1588 = vmatprep.mubr.msk.bf16.mxu0 %vm534_vm3, %v1792_v30 }
 0x1e5   : > { %1586 = vmatprep.subr.bf16.mxu0 %v955_v14 }
 0x1e8   : > { %1587 = vmatpush3.bf16.msra.mxu0 %v955_v14 }
 0x1e9   : > { %1600 = vmatprep.subr.bf16.mxu0 %v1086_v18 }
 0x1eb   : > { %1589 = vmatmul.mubr.msk.bf16.vlgmr.msra.gmra.mrb[16].mxu0 %vm534_vm3, %v1663_v22 }
 0x1ec   : > { %1601 = vmatpush3.bf16.msra.mxu0 %v1086_v18  ;;  %1604 = vmatprep.mubr.msk.bf16.mxu0 %vm534_vm3, %v1792_v30 }
 0x1ed   : > { %1602 = vmatprep.subr.bf16.mxu0 %v1087_v15 }
 0x1f0   : > { %1603 = vmatpush3.bf16.msra.mxu0 %v1087_v15 }
 0x1f1   : > { %1616 = vmatprep.subr.bf16.mxu0 %v1199_v57 }
 0x1f3   : > { %1605 = vmatmul.mubr.msk.bf16.vlgmr.msra.gmra.mrb[20].mxu0 %vm534_vm3, %v1663_v22 }
 0x1f4   : > { %1617 = vmatpush3.bf16.msra.mxu0 %v1199_v57  ;;  %1620 = vmatprep.mubr.msk.bf16.mxu0 %vm534_vm3, %v1792_v30 }
 0x1f5   : > { %1618 = vmatprep.subr.bf16.mxu0 %v1796_v56 }
 0x1f8   : > { %1619 = vmatpush3.bf16.msra.mxu0 %v1796_v56 }
 0x1fb   : > { %1621 = vmatmul.mubr.msk.bf16.vlgmr.msra.gmra.mrb[24].mxu0 %vm534_vm3, %v1663_v22  ;;  %v1068_v22 = vpop.permute.xlu1 %1067 }
 0x2ae   : > { %v1558_v25 = vpop.f32.mrb[8].mxu0 }
 0x2af   : > { %v743_v26 = vpop.f32.mrb[9].mxu0  ;;  %v758_v30 = vpack.c.bf16 %v1558_v25, %v1558_v25 }
 0x2b0   : > { %v1559_v27 = vpop.f32.mrb[10].mxu0 }
 0x2b1   : > { %v746_v28 = vpop.f32.mrb[11].mxu0 }
 0x2b2   : > { %v757_v29 = vpack.c.bf16 %v746_v28, %v743_v26 }
 0x2b4   : > { %1564 = vmatprep.mubr.msk.bf16.mxu1 %vm534_vm3, %v757_v29 }
 0x2b5   : > { %1565 = vmatmul.mubr.msk.bf16.vlgmr.msra.gmra.mrb[8].mxu1 %vm534_vm3, %v758_v30 }
 0x2b6   : > { %v1574_v31 = vpop.f32.mrb[12].mxu0  ;;  %1577 = vmatpush3.bf16.msra.mxu1 %v1815_v23 }
 0x2b7   : > { %v861_v32 = vpop.f32.mrb[13].mxu0  ;;  %1578 = vmatprep.subr.bf16.mxu1 %v1665_v24  ;;  %v876_v36 = vpack.c.bf16 %v1574_v31, %v1574_v31 }
 0x2b8   : > { %v1575_v33 = vpop.f32.mrb[14].mxu0 }
 0x2b9   : > { %v864_v34 = vpop.f32.mrb[15].mxu0 }
 0x2ba   : > { %v875_v35 = vpack.c.bf16 %v864_v34, %v861_v32  ;;  %1579 = vmatpush3.bf16.msra.mxu1 %v1665_v24 }
 0x2bb   : > { %1592 = vmatprep.subr.bf16.mxu1 %v1815_v23 }
 0x2bc   : > { %1580 = vmatprep.mubr.msk.bf16.mxu1 %vm534_vm3, %v875_v35 }
 0x2bd   : > { %1581 = vmatmul.mubr.msk.bf16.vlgmr.msra.gmra.mrb[12].mxu1 %vm534_vm3, %v876_v36 }
 0x2be   : > { %v1590_v37 = vpop.f32.mrb[16].mxu0  ;;  %1593 = vmatpush3.bf16.msra.mxu1 %v1815_v23 }
 0x2bf   : > { %v990_v38 = vpop.f32.mrb[17].mxu0  ;;  %1594 = vmatprep.subr.bf16.mxu1 %v1665_v24  ;;  %v1005_v42 = vpack.c.bf16 %v1590_v37, %v1590_v37 }
 0x2c0   : > { %v1591_v39 = vpop.f32.mrb[18].mxu0 }
 0x2c1   : > { %v993_v40 = vpop.f32.mrb[19].mxu0 }
 0x2c2   : > { %v1004_v41 = vpack.c.bf16 %v993_v40, %v990_v38  ;;  %1595 = vmatpush3.bf16.msra.mxu1 %v1665_v24 }
 0x2c3   : > { %1608 = vmatprep.subr.bf16.mxu1 %v1815_v23 }
 0x2c4   : > { %1596 = vmatprep.mubr.msk.bf16.mxu1 %vm534_vm3, %v1004_v41 }
 0x2c5   : > { %1597 = vmatmul.mubr.msk.bf16.vlgmr.msra.gmra.mrb[16].mxu1 %vm534_vm3, %v1005_v42 }
 0x2c6   : > { %v1606_v43 = vpop.f32.mrb[20].mxu0  ;;  %1609 = vmatpush3.bf16.msra.mxu1 %v1815_v23 }
 0x2c7   : > { %v1122_v44 = vpop.f32.mrb[21].mxu0  ;;  %1610 = vmatprep.subr.bf16.mxu1 %v1665_v24  ;;  %v1137_v48 = vpack.c.bf16 %v1606_v43, %v1606_v43 }
 0x2c8   : > { %v1607_v45 = vpop.f32.mrb[22].mxu0 }
 0x2c9   : > { %v1125_v46 = vpop.f32.mrb[23].mxu0 }
 0x2ca   : > { %v1136_v47 = vpack.c.bf16 %v1125_v46, %v1122_v44  ;;  %1611 = vmatpush3.bf16.msra.mxu1 %v1665_v24 }
 0x2cb   : > { %1624 = vmatprep.subr.bf16.mxu1 %v1815_v23 }
 0x2cc   : > { %1612 = vmatprep.mubr.msk.bf16.mxu1 %vm534_vm3, %v1136_v47 }
 0x2cd   : > { %1613 = vmatmul.mubr.msk.bf16.vlgmr.msra.gmra.mrb[20].mxu1 %vm534_vm3, %v1137_v48 }
 0x2ce   : > { %v1622_v49 = vpop.f32.mrb[24].mxu0  ;;  %1625 = vmatpush3.bf16.msra.mxu1 %v1815_v23 }
 0x2cf   : > { %v1235_v50 = vpop.f32.mrb[25].mxu0  ;;  %1626 = vmatprep.subr.bf16.mxu1 %v1665_v24  ;;  %v1250_v54 = vpack.c.bf16 %v1622_v49, %v1622_v49 }
 0x2d0   : > { %v1623_v51 = vpop.f32.mrb[26].mxu0 }
 0x2d1   : > { %v1238_v52 = vpop.f32.mrb[27].mxu0 }
 0x2d2   : > { %v1249_v53 = vpack.c.bf16 %v1238_v52, %v1235_v50  ;;  %1627 = vmatpush3.bf16.msra.mxu1 %v1665_v24 }
 0x2d4   : > { %1628 = vmatprep.mubr.msk.bf16.mxu1 %vm534_vm3, %v1249_v53 }
 0x2d5   : > { %1629 = vmatmul.mubr.msk.bf16.vlgmr.msra.gmra.mrb[24].mxu1 %vm534_vm3, %v1250_v54 }
 0x388   : > { %v1566_v55 = vpop.f32.mrb[8].mxu1 }
 0x389   : > { %v811_v56 = vpop.f32.mrb[9].mxu1  ;;  %v933_v60 = vmul.f32 %v1566_v55, %v1566_v55 }
 0x38a   : > { %v1567_v57 = vpop.f32.mrb[10].mxu1  ;;  %v931_v0 = vmul.f32 %v811_v56, %v811_v56 }
 0x38b   : > { %v814_v58 = vpop.f32.mrb[11].mxu1 }
 0x38c   : > { %v932_v6 = vmul.f32 %v814_v58, %v814_v58 }
 0x390   : > { %v1582_v59 = vpop.f32.mrb[12].mxu1 }
 0x391   : > { %v936_v61 = vmul.f32 %v1582_v59, %v1582_v59  ;;  %v939_v62 = vmul.f32 %v1582_v59, %v1566_v55  ;;  %v917_v63 = vpop.f32.mrb[13].mxu1 }
 0x392   : > { %v934_v1 = vmul.f32 %v917_v63, %v917_v63  ;;  %v937_v2 = vmul.f32 %v917_v63, %v811_v56  ;;  %v1583_v3 = vpop.f32.mrb[14].mxu1 }
 0x393   : > { %v1078_v4 = vadd.f32 %v936_v61, %v933_v60  ;;  %v920_v5 = vpop.f32.mrb[15].mxu1  ;;  %v942_v13 = vmul.f32 2.0, %v939_v62 }
 0x394   : > { %v1076_v7 = vadd.f32 %v934_v1, %v931_v0  ;;  %v935_v8 = vmul.f32 %v920_v5, %v920_v5  ;;  %v938_v9 = vmul.f32 %v920_v5, %v814_v58  ;;  %v940_v16 = vmul.f32 2.0, %v937_v2 }
 0x395   : > { %v949_v26 = vadd.f32 %v945_v10, %v942_v13  ;;  %v1081_v52 = vadd.f32 %v1078_v4, %v945_v10  ;;  %v673_v13 = vpop.xlane.xlu0 %672 }
 0x396   : > { %v1077_v11 = vadd.f32 %v935_v8, %v932_v6  ;;  %v941_v23 = vmul.f32 2.0, %v938_v9  ;;  %v947_v28 = vadd.f32 %v945_v10, %v940_v16  ;;  %v1079_v54 = vadd.f32 %v1076_v7, %v945_v10 }
 0x398   : > { %v1598_v12 = vpop.f32.mrb[16].mxu1  ;;  %v948_v32 = vadd.f32 %v945_v10, %v941_v23  ;;  %v1080_v58 = vadd.f32 %v1077_v11, %v945_v10 }
 0x399   : > { %v1062_v14 = vsub.f32 %v1598_v12, %v939_v62  ;;  %v1046_v15 = vpop.f32.mrb[17].mxu1 }
 0x39a   : > { %v1060_v17 = vsub.f32 %v1046_v15, %v937_v2  ;;  %v1599_v18 = vpop.f32.mrb[18].mxu1  ;;  %v667_v15 = vpop.xlane.xlu0 %666 }
 0x39b   : > { %v1065_v20 = vmul.f32 2.0, %v1062_v14  ;;  %v1049_v21 = vpop.f32.mrb[19].mxu1  ;;  %v670_v14 = vpop.xlane.xlu1 %669 }
 0x39c   : > { %v1063_v24 = vmul.f32 2.0, %v1060_v17  ;;  %v1061_v25 = vsub.f32 %v1049_v21, %v938_v9  ;;  %v664_v9 = vmul.f32 %v1799_v19, %v1799_v19  ;;  %v677_v16 = vadd.f32 %v670_v14, %v667_v15 }
 0x39d   : > { %v1072_v27 = vadd.f32 %v1068_v22, %v1065_v20 }
 0x39e   : > { %v1070_v29 = vadd.f32 %v1068_v22, %v1063_v24  ;;  %v1064_v30 = vmul.f32 2.0, %v1061_v25  ;;  %v674_v11 = vsel %vm534_vm3, %v664_v9, 0.0  ;;  %v678_v20 = vadd.f32 %v677_v16, %v673_v13 }
 0x39f   : > { %v1075_v31 = vmul.f32 %v1072_v27, %v949_v26 }
 0x3a0   : > { %v1071_v33 = vadd.f32 %v1068_v22, %v1064_v30  ;;  %v1614_v34 = vpop.f32.mrb[20].mxu1  ;;  %v1073_v35 = vmul.f32 %v1070_v29, %v947_v28 }
 0x3a1   : > { %v1194_v36 = vsub.f32 %v1614_v34, %v933_v60  ;;  %v1178_v37 = vpop.f32.mrb[21].mxu1 }
 0x3a2   : > { %v1192_v38 = vsub.f32 %v1178_v37, %v931_v0  ;;  %v1615_v39 = vpop.f32.mrb[22].mxu1  ;;  %v1074_v40 = vmul.f32 %v1071_v33, %v948_v32 }
 0x3a3   : > { %v1181_v41 = vpop.f32.mrb[23].mxu1 }
 0x3a4   : > { %v1193_v42 = vsub.f32 %v1181_v41, %v932_v6 }
 0x3a8   : > { %v1630_v43 = vpop.f32.mrb[24].mxu1 }
 0x3a9   : > { %v1307_v44 = vsub.f32 %v1630_v43, %v936_v61  ;;  %v1291_v45 = vpop.f32.mrb[25].mxu1  ;;  %v1323_v61 = vlaneseq }
 0x3aa   : > { %v1305_v46 = vsub.f32 %v1291_v45, %v934_v1  ;;  %v1631_v47 = vpop.f32.mrb[26].mxu1 }
 0x3ab   : > { %v1310_v48 = vadd.f32 %v1307_v44, %v1194_v36  ;;  %v1294_v49 = vpop.f32.mrb[27].mxu1  ;;  %v1324_v63 = vshrl.u32 %v1323_v61, 7  ;;  %v1328_v0 = vand.u32 127, %v1323_v61 }
 0x3ac   : > { %v1308_v50 = vadd.f32 %v1305_v46, %v1192_v38  ;;  %v1306_v51 = vsub.f32 %v1294_v49, %v935_v8 }
 0x3ad   : > { %v1313_v53 = vadd.f32 %v1310_v48, %v1068_v22  ;;  %v1326_v2 = vadd.s32 16, %v1324_v63  ;;  %vm1332_vm4 = vcmp.lt.s32.totalorder %v1328_v0, 22  ;;  %vm1353_vm7 = vcmp.eq.s32.totalorder %v1328_v0, 0 }
 0x3ae   : > { %v1311_v55 = vadd.f32 %v1308_v50, %v1068_v22  ;;  %v1309_v56 = vadd.f32 %v1306_v51, %v1193_v42  ;;  %vm1356_vm8 = vcmp.eq.s32.totalorder %v1328_v0, 1 }
 0x3af   : > { %v1316_v57 = vmul.f32 %v1313_v53, %v1081_v52  ;;  %vm1331_vm5 = vcmp.lt.s32.totalorder %v1326_v2, 22 }
 0x3b0   : > { %v1314_v59 = vmul.f32 %v1311_v55, %v1079_v54  ;;  %v1312_v60 = vadd.f32 %v1309_v56, %v1068_v22  ;;  %vm1335_vm6 = vmand %vm1331_vm5, %vm1332_vm4 }
 0x3b1   : > { %1666 = vrcp.f32 %v1316_v57 }
 0x3b2   : > { %1668 = vrcp.f32 %v1314_v59  ;;  %v1315_v62 = vmul.f32 %v1312_v60, %v1080_v58 }
 0x3b4   : > { %1670 = vrcp.f32 %v1315_v62 }
 0x3bb   : > { %v1667_v1 = vpop.eup %1666 }
 0x3bc   : > { %v1669_v3 = vpop.eup %1668  ;;  %v1322_v5 = vmul.f32 %v1667_v1, %v1075_v31 }
 0x3bd   : > { %v1318_v4 = vmul.f32 %v1669_v3, %v1073_v35 }
 0x3be   : > { %v1671_v6 = vpop.eup %1670  ;;  %v1338_v12 = vsel %vm1335_vm6, %v1322_v5, 0.0 }
 0x3bf   : > { %v1336_v7 = vsel %vm1332_vm4, %v1318_v4, 0.0  ;;  %v1320_v8 = vmul.f32 %v1671_v6, %v1074_v40 }
 0x3c0   : > { %1339 = vadd.xlane.f32.xlu0 %v1336_v7 }
 0x3c1   : > { %v1337_v10 = vsel %vm1332_vm4, %v1320_v8, 0.0 }
 0x3c2   : > { %1341 = vadd.xlane.f32.xlu1 %v1337_v10 }
 0x3c4   : > { %675 = vadd.xlane.f32.xlu0 %v674_v11 }
 0x3c6   : > { %1343 = vadd.xlane.f32.xlu1 %v1338_v12 }
 0x44d   : > { %v1340_v17 = vpop.xlane.xlu0 %1339 }
 0x44f   : > { %v1342_v18 = vpop.xlane.xlu1 %1341 }
 0x450   : > { %v1345_v22 = vadd.f32 %v1342_v18, %v1340_v17 }
 0x451   : > { %v676_v21 = vpop.xlane.xlu0 %675 }
 0x452   : > { %v679_v19 = vadd.f32 %v678_v20, %v676_v21 }
 0x453   : > { %v1344_v23 = vpop.xlane.xlu1 %1343 }
 0x454   : > { %v680_v24 = vrot.slane %v679_v19, 4  ;;  %v1346_v25 = vadd.f32 %v1345_v22, %v1344_v23 }
 0x456   : > { %v681_v26 = vadd.f32 %v680_v24, %v679_v19  ;;  %v1347_v27 = vrot.slane %v1346_v25, 4 }
 0x458   : > { %v682_v28 = vrot.slane %v681_v26, 2  ;;  %v1348_v29 = vadd.f32 %v1347_v27, %v1346_v25 }
 0x45a   : > { %v683_v30 = vadd.f32 %v682_v28, %v681_v26  ;;  %v1349_v31 = vrot.slane %v1348_v29, 2 }
 0x45c   : > { %v684_v32 = vrot.slane %v683_v30, 1  ;;  %v1350_v33 = vadd.f32 %v1349_v31, %v1348_v29 }
 0x45e   : > { %v685_v34 = vadd.f32 %v684_v32, %v683_v30  ;;  %v1351_v35 = vrot.slane %v1350_v33, 1 }
 0x460   : > { %v1352_v36 = vadd.f32 %v1351_v35, %v1350_v33  ;;  %v1354_v37 = vsel %vm1353_vm7, %v685_v34, 0.0 }
 0x462   : > { %v1357_v38 = vsel %vm1356_vm8, %v1352_v36, 0.0 }
 0x463   : > { %v1358_v39 = vadd.f32 %v1357_v38, %v1354_v37 }
 0x465   : > { %1360 = vst.msk [vmem:[%s345_s26] sm:$0x1] %vm1359_vm9, %v1358_v39 }
 0x466 PF: > { %s19_s30 = sadd.s32 1, %s1678_s30  }
 0x467   : > { %p16_p4 = scmp.ge.s32.totalorder %s19_s30, 10  }
 0x469   :  { %18 = sbr.rel (!%p16_p4) target bundleno = 1 (0x1), region = 89 }

</bundles_post_ra>
